<compile_context>
chip_gen: v7x
topology: tpu7x:2x2x1
jax: 0.10.0
libtpu: 0.0.40
codegen_flags: <defaults>
</compile_context>

<pallas_src>
import jax
import jax.numpy as jnp
from jax import lax
from jax.experimental import pallas as pl
from jax.experimental.pallas import tpu as pltpu


def fused_model_kernel(x_ref, w_ref, b_ref, o_ref, v1_scr):
    # x_ref : (N, C, H*W) f32    w_ref : (C, C)    b_ref : (C, 1)
    # o_ref : (N, C, H*W) f32    v1_scr: (N, C, H*W) f32 VMEM scratch
    N, C, HW = x_ref.shape
    H = C                       # model constraint: C == H == W
    W = HW // H

    w = w_ref[...]              # (C, C)
    b = b_ref[...]              # (C, 1)

    # ---- 1x1 conv for ALL batches in ONE MXU matmul ----------------------
    # Lane-dense (C, N*HW) RHS: batches concatenated along the lane axis.
    # One MXU push/drain sequence and one bias broadcast instead of N of each.
    x_all = jnp.concatenate([x_ref[n] for n in range(N)], axis=-1)       # (C, N*HW)
    v1_all = jnp.dot(w, x_all, preferred_element_type=jnp.float32) + b   # (C, N*HW)

    # Park v1 per batch in VMEM scratch so the loop below only keeps a single
    # batch's intermediates live.  Static, 128-lane-aligned slices.
    for n in range(N):
        v1_scr[n] = v1_all[:, n * HW:(n + 1) * HW]

    # ---- per batch: v4 = v3 @ transpose(v1, 1, 2); fused epilogue --------
    def per_batch(n, carry):
        v1_n = v1_scr[n]                              # (C, HW) lane-dense
        v3_n = jnp.maximum(v1_n, 0.0)                 # relu(v1), lane-dense

        v1_3 = v1_n.reshape(C, H, W)                  # (C, H, W)
        v3_3 = v3_n.reshape(C, H, W)
        # v4[c,i,j] = sum_k v3[c,i,k] * v1[k,c,j]
        # (The transpose-folded dot_general with rhs batch dim at position 1
        #  is not reliably lowered by Mosaic; keep the canonical batch-leading
        #  batched contraction with an explicit operand permutation.)
        v2_3 = jnp.swapaxes(v1_3, 0, 1)               # v2[c,k,j] = v1[k,c,j]
        v4_3 = jnp.einsum("cik,ckj->cij", v3_3, v2_3,
                          preferred_element_type=jnp.float32)   # (C, H, W)

        # Epilogue in the lane-dense (C, HW) layout: full 256-lane vregs,
        # unmasked vst, reuses the already lane-dense v3_n.
        o_ref[n] = jnp.maximum(v4_3.reshape(C, HW) + v3_n, 0.0)
        return carry

    lax.fori_loop(0, N, per_batch, 0)


def model_forward(x, w, b):
    N, C, H, W = x.shape
    if not (C == H == W):
        raise ValueError(
            "torch.matmul(v3, transpose(v1, 1, 2)) requires C == H == W "
            f"(got C={C}, H={H}, W={W})")
    HW = H * W                       # 256: multiple of 128 -> unmasked vld/vst

    x_flat = x.reshape(N, C, HW)     # free reshape; lane-dense kernel boundary

    # Advisory cost for XLA's scheduler: conv + batched contraction + epilogue.
    flops = 2 * N * C * C * HW + 2 * N * C * H * W * W + 4 * N * C * HW
    bytes_accessed = (2 * N * C * HW + C * C + C) * 4

    out_flat = pl.pallas_call(
        fused_model_kernel,
        out_shape=jax.ShapeDtypeStruct((N, C, HW), jnp.float32),
        # Whole problem (~200 KB incl. scratch) is one VMEM-resident block; a
        # grid would only add per-step overhead at this size.  If N grows,
        # switch to grid=(N,) + dimension_semantics=("parallel",) so both v7x
        # TensorCores are used, and re-derive block sizes against v7x's 64 MiB
        # VMEM (raise vmem_limit_bytes via pltpu.CompilerParams if needed).
        in_specs=[
            pl.BlockSpec(memory_space=pltpu.MemorySpace.VMEM),   # x
            pl.BlockSpec(memory_space=pltpu.MemorySpace.VMEM),   # conv weight
            pl.BlockSpec(memory_space=pltpu.MemorySpace.VMEM),   # conv bias
        ],
        out_specs=pl.BlockSpec(memory_space=pltpu.MemorySpace.VMEM),
        scratch_shapes=[pltpu.VMEM((N, C, HW), jnp.float32)],    # parked v1
        cost_estimate=pl.CostEstimate(
            flops=flops, transcendentals=0, bytes_accessed=bytes_accessed),
    )(x_flat, w, b)

    return out_flat.reshape(N, C, H, W)


if __name__ == "__main__":
    key = jax.random.PRNGKey(0)
    kx, kw, kb = jax.random.split(key, 3)

    # Forward pass requires C == H == W for torch.matmul broadcasting to work.
    N, C, H, W = 2, 16, 16, 16
    x = jax.random.normal(kx, (N, C, H, W), jnp.float32)

    # Conv2d(16, 16, 1) parameters (PyTorch-style U(-1/sqrt(fan_in), +1/sqrt(fan_in)))
    fan_in = C
    bound = 1.0 / (fan_in ** 0.5)
    w = jax.random.uniform(kw, (C, C), jnp.float32, -bound, bound)
    b = jax.random.uniform(kb, (C, 1), jnp.float32, -bound, bound)

    fwd = jax.jit(model_forward)
    out = jax.block_until_ready(fwd(x, w, b))

    # Pure-JAX reference for correctness
    v1 = jnp.einsum("oc,nchw->nohw", w, x) + b.reshape(1, C, 1, 1)
    v2 = jnp.transpose(v1, (0, 2, 1, 3))
    v3 = jnp.maximum(v1, 0.0)
    v4 = jnp.einsum("ncik,nckj->ncij", v3, v2)
    ref = jnp.maximum(v4 + v3, 0.0)

    assert out.shape == (N, C, H, W)
    assert jnp.allclose(out, ref, atol=1e-3, rtol=1e-3), "mismatch vs reference"
    print("KERNEL_OK")
</pallas_src>

<mosaic_0001>
module attributes {stable_mosaic.version = 11 : i64} {
  func.func @fused_model_kernel(%arg0: memref<2x16x256xf32, #tpu.memory_space<vmem>>, %arg1: memref<16x16xf32, #tpu.memory_space<vmem>>, %arg2: memref<16x1xf32, #tpu.memory_space<vmem>>, %arg3: memref<2x16x256xf32, #tpu.memory_space<vmem>>, %arg4: memref<2x16x256xf32, #tpu.memory_space<vmem>>) attributes {dimension_semantics = [], scalar_prefetch = 0 : i64, scratch_operands = 1 : i64, tpu.core_type = #tpu.core_type<tc>} {
    %c0 = arith.constant 0 : index
    %c0_0 = arith.constant 0 : index
    %0 = vector.load %arg1[%c0, %c0_0] : memref<16x16xf32, #tpu.memory_space<vmem>>, vector<16x16xf32>
    %c0_1 = arith.constant 0 : index
    %c0_2 = arith.constant 0 : index
    %1 = vector.load %arg2[%c0_1, %c0_2] : memref<16x1xf32, #tpu.memory_space<vmem>>, vector<16x1xf32>
    %c0_3 = arith.constant 0 : index
    %c0_4 = arith.constant 0 : index
    %c0_5 = arith.constant 0 : index
    %2 = vector.load %arg0[%c0_3, %c0_4, %c0_5] : memref<2x16x256xf32, #tpu.memory_space<vmem>>, vector<1x16x256xf32>
    %3 = vector.shape_cast %2 : vector<1x16x256xf32> to vector<16x256xf32>
    %c1 = arith.constant 1 : index
    %c0_6 = arith.constant 0 : index
    %c0_7 = arith.constant 0 : index
    %4 = vector.load %arg0[%c1, %c0_6, %c0_7] : memref<2x16x256xf32, #tpu.memory_space<vmem>>, vector<1x16x256xf32>
    %5 = vector.shape_cast %4 : vector<1x16x256xf32> to vector<16x256xf32>
    %6 = tpu.concatenate %3, %5 in 1 : vector<16x256xf32>, vector<16x256xf32> -> vector<16x512xf32>
    %cst = arith.constant dense<0.000000e+00> : vector<16x512xf32>
    %7 = tpu.matmul %0, %6, %cst {dimension_numbers = #tpu.dot_dimension_numbers<[1], [0], [0], [1], [0, 0, 1, 1], [], []>} : vector<16x16xf32>, vector<16x512xf32>, vector<16x512xf32> -> vector<16x512xf32>
    %8 = vector.broadcast %1 : vector<16x1xf32> to vector<16x512xf32>
    %9 = arith.addf %7, %8 : vector<16x512xf32>
    %10 = vector.extract_strided_slice %9 {offsets = [0, 0], sizes = [16, 256], strides = [1, 1]} : vector<16x512xf32> to vector<16x256xf32>
    %c0_8 = arith.constant 0 : index
    %c0_9 = arith.constant 0 : index
    %c0_10 = arith.constant 0 : index
    %11 = vector.load %arg4[%c0_8, %c0_9, %c0_10] : memref<2x16x256xf32, #tpu.memory_space<vmem>>, vector<1x16x256xf32>
    %12 = vector.shape_cast %11 : vector<1x16x256xf32> to vector<16x256xf32>
    %13 = vector.shape_cast %10 : vector<16x256xf32> to vector<1x16x256xf32>
    tpu.vector_store %arg4[%c0_8, %c0_9, %c0_10], %13 {strides = array<i32>} : memref<2x16x256xf32, #tpu.memory_space<vmem>>, vector<1x16x256xf32>,
    %14 = vector.extract_strided_slice %9 {offsets = [0, 256], sizes = [16, 256], strides = [1, 1]} : vector<16x512xf32> to vector<16x256xf32>
    %c1_11 = arith.constant 1 : index
    %c0_12 = arith.constant 0 : index
    %c0_13 = arith.constant 0 : index
    %15 = vector.load %arg4[%c1_11, %c0_12, %c0_13] : memref<2x16x256xf32, #tpu.memory_space<vmem>>, vector<1x16x256xf32>
    %16 = vector.shape_cast %15 : vector<1x16x256xf32> to vector<16x256xf32>
    %17 = vector.shape_cast %14 : vector<16x256xf32> to vector<1x16x256xf32>
    tpu.vector_store %arg4[%c1_11, %c0_12, %c0_13], %17 {strides = array<i32>} : memref<2x16x256xf32, #tpu.memory_space<vmem>>, vector<1x16x256xf32>,
    %c0_i32 = arith.constant 0 : i32
    %c2_i32 = arith.constant 2 : i32
    %18 = arith.addi %c0_i32, %c2_i32 : i32
    %c1_i32 = arith.constant 1 : i32
    scf.for %arg5 = %c0_i32 to %18 step %c1_i32  : i32 {
      %19 = arith.index_cast %arg5 : i32 to index
      %c0_15 = arith.constant 0 : index
      %c0_16 = arith.constant 0 : index
      %20 = vector.load %arg4[%19, %c0_15, %c0_16] : memref<2x16x256xf32, #tpu.memory_space<vmem>>, vector<1x16x256xf32>
      %21 = vector.shape_cast %20 : vector<1x16x256xf32> to vector<16x256xf32>
      %cst_17 = arith.constant 0.000000e+00 : f32
      %22 = vector.broadcast %cst_17 : f32 to vector<16x256xf32>
      %23 = arith.maximumf %21, %22 : vector<16x256xf32>
      %24 = vector.shape_cast %21 : vector<16x256xf32> to vector<16x16x16xf32>
      %25 = vector.shape_cast %23 : vector<16x256xf32> to vector<16x16x16xf32>
      %26 = tpu.transpose %24, [1, 0, 2] : vector<16x16x16xf32> -> vector<16x16x16xf32>
      "tpu.trace_start"() <{level = 10 : i32, message = "cik,ckj->cij"}> : () -> ()
      %cst_18 = arith.constant dense<0.000000e+00> : vector<16x16x16xf32>
      %27 = tpu.matmul %25, %26, %cst_18 {dimension_numbers = #tpu.dot_dimension_numbers<[2], [1], [1], [2], [0, 0, 0, 1, 1, 2], [0], [0]>} : vector<16x16x16xf32>, vector<16x16x16xf32>, vector<16x16x16xf32> -> vector<16x16x16xf32>
      "tpu.trace_stop"() : () -> ()
      %28 = vector.shape_cast %27 : vector<16x16x16xf32> to vector<16x256xf32>
      %29 = arith.addf %28, %23 : vector<16x256xf32>
      %cst_19 = arith.constant 0.000000e+00 : f32
      %30 = vector.broadcast %cst_19 : f32 to vector<16x256xf32>
      %31 = arith.maximumf %29, %30 : vector<16x256xf32>
      %32 = arith.index_cast %arg5 : i32 to index
      %c0_20 = arith.constant 0 : index
      %c0_21 = arith.constant 0 : index
      %33 = vector.load %arg3[%32, %c0_20, %c0_21] : memref<2x16x256xf32, #tpu.memory_space<vmem>>, vector<1x16x256xf32>
      %34 = vector.shape_cast %33 : vector<1x16x256xf32> to vector<16x256xf32>
      %35 = vector.shape_cast %31 : vector<16x256xf32> to vector<1x16x256xf32>
      tpu.vector_store %arg3[%32, %c0_20, %c0_21], %35 {strides = array<i32>} : memref<2x16x256xf32, #tpu.memory_space<vmem>>, vector<1x16x256xf32>,
    }
    %c2_i32_14 = arith.constant 2 : i32
    return
  }
}

</mosaic_0001>

<bundles_post_ra>
// kernel: model_forward.1
= control target key start
LH: loop header
LB: loop body
LE: loop exit
PB: predicated region body
PF: predicated region fallthrough
CT: control target
= control target key end

     0   :  { %v4398_v3 = vmov 0.0   ;;  %v4399_v8 = vmov 0   ;;  %vm37_vm0 = vcmask 130048   ;;  %s5440_s0 = inlined_call_operand.vmem [shape: f32[2,16,256], index: 0, kind: input, shape index: {}]   ;;  %s5441_s3 = inlined_call_operand.vmem [shape: f32[2,16,256], index: 3, kind: output, shape index: {}]   ;;  %s5442_s2 = inlined_call_operand.vmem [shape: f32[16,1], index: 2, kind: input, shape index: {}]   ;;  %s5443_s1 = inlined_call_operand.vmem [shape: f32[16,16], index: 1, kind: input, shape index: {}]  }
   0x1   :  { %v19_v0 = vld [vmem:[%s5440_s0 + $0x8] sm:$0xff]  ;;  %v21_v1 = vld [vmem:[%s5440_s0 + $0x18] sm:$0xff]  ;;  %108 = vmatprep.mubr.f32.mxu0 %v4398_v3  ;;  %185 = vmatprep.mubr.f32.mxu1 %v4398_v3  ;;  %v18_v6 = vld [vmem:[%s5440_s0] sm:$0xff] }
   0x2   :  { %v4046_v2 = vld [vmem:[%s5440_s0 + $0x28] sm:$0xff]  ;;  %v4298_v4 = vpack.c.bf16 %v21_v1, %v19_v0  ;;  %v4048_v5 = vld [vmem:[%s5440_s0 + $0x38] sm:$0xff]  ;;  %v20_v7 = vld [vmem:[%s5440_s0 + $0x10] sm:$0xff]  ;;  %4389 = vset.pattern.permute.xlu0 %v4399_v8 }
   0x3   :  { %v4302_v9 = vpack.c.bf16 %v4048_v5, %v4046_v2  ;;  %v4300_v10 = vpack.c.bf16 %v20_v7, %v18_v6  ;;  %v4045_v11 = vld [vmem:[%s5440_s0 + $0x20] sm:$0xff]  ;;  %v4047_v12 = vld [vmem:[%s5440_s0 + $0x30] sm:$0xff]  ;;  %v17_v16 = vld [vmem:[%s5442_s2 + $0x8] sm:$0xff] }
   0x4   :  { %4299 = vmatprep.subr.bf16.mxu0 %v4298_v4  ;;  %v4304_v13 = vpack.c.bf16 %v4047_v12, %v4045_v11  ;;  %v16_v14 = vld [vmem:[%s5442_s2] sm:$0xff]  ;;  %v15_v17 = vld [vmem:[%s5443_s1 + $0x8] sm:$0xff] }
   0x5   :  { %4303 = vmatprep.subr.bf16.mxu1 %v4302_v9  ;;  %4301 = vmatpush1.bf16.msra.mxu0 %v4300_v10  ;;  %v14_v15 = vld [vmem:[%s5443_s1] sm:$0xff]  ;;  %s4469_s1 = smov 0  }
   0x6   :  { %4305 = vmatpush1.bf16.msra.mxu1 %v4304_v13  ;;  %29 = vperm.xlu0 %4389, %v16_v14  }
   0x8   :  { %4049 = vmatmul.mubr.msk.f32.vlgmr.msra.gmra.mrb[0].mxu0 %vm37_vm0, %v14_v15 }
   0x9   :  { %4051 = vmatmul.mubr.msk.f32.vlgmr.msra.gmra.mrb[0].mxu1 %vm37_vm0, %v14_v15  ;;  %114 = vmatprep.mubr.f32.mxu0 %v4398_v3 }
   0xa   :  { %191 = vmatprep.mubr.f32.mxu1 %v4398_v3  ;;  %34 = vperm.xlu0 %4389, %v17_v16  }
   0xc   :  { %4050 = vmatmul.mubr.msk.f32.gmra.mrb[2].mxu0 %vm37_vm0, %v15_v17 }
   0xd   :  { %4052 = vmatmul.mubr.msk.f32.gmra.mrb[2].mxu1 %vm37_vm0, %v15_v17 }
  0x85   :  { %v30_v18 = vpop.permute.xlu0 %29 }
  0x89   :  { %v35_v27 = vpop.permute.xlu0 %34 }
  0xdb   :  { %v110_v19 = vpop.f32.mrb[0].mxu0 }
  0xdc   :  { %v111_v20 = vadd.f32 %v110_v19, %v30_v18  ;;  %v187_v21 = vpop.f32.mrb[0].mxu1  ;;  %v112_v22 = vpop.f32.mrb[1].mxu0 }
  0xdd   :  { %v188_v23 = vadd.f32 %v187_v21, %v30_v18  ;;  %v113_v24 = vadd.f32 %v112_v22, %v30_v18  ;;  %v189_v25 = vpop.f32.mrb[1].mxu1 }
  0xde   :  { %198 = vst [vmem:[#allocation2] sm:$0xff] %v111_v20  ;;  %v190_v26 = vadd.f32 %v189_v25, %v30_v18 }
  0xdf   :  { %203 = vst [vmem:[#allocation2 + $0x20] sm:$0xff] %v188_v23  ;;  %199 = vst [vmem:[#allocation2 + $0x8] sm:$0xff] %v113_v24  ;;  %v116_v28 = vpop.f32.mrb[2].mxu0 }
  0xe0   :  { %204 = vst [vmem:[#allocation2 + $0x28] sm:$0xff] %v190_v26  ;;  %v117_v29 = vadd.f32 %v116_v28, %v35_v27  ;;  %v193_v30 = vpop.f32.mrb[2].mxu1  ;;  %v118_v31 = vpop.f32.mrb[3].mxu0 }
  0xe1   :  { %v194_v32 = vadd.f32 %v193_v30, %v35_v27  ;;  %v119_v33 = vadd.f32 %v118_v31, %v35_v27  ;;  %v195_v34 = vpop.f32.mrb[3].mxu1 }
  0xe2   :  { %200 = vst [vmem:[#allocation2 + $0x10] sm:$0xff] %v117_v29  ;;  %v196_v35 = vadd.f32 %v195_v34, %v35_v27 }
  0xe3   :  { %205 = vst [vmem:[#allocation2 + $0x30] sm:$0xff] %v194_v32  ;;  %201 = vst [vmem:[#allocation2 + $0x18] sm:$0xff] %v119_v33 }
  0xe4   :  { %206 = vst [vmem:[#allocation2 + $0x38] sm:$0xff] %v196_v35 }
  0xe5 LB: > { %s4120_s2 = sshll.u32 %s4396_s1, 5  ;;  %s4400_s9 = smov 96   ;;  %v4407_v44 = vmov 1983009808   ;;  %v317_v46 = vlaneseq  ;;  %v4408_v49 = vmov 1934713408   ;;  %s4396_s1 = sphi %s4469_s1, %s212_s1  }
  0xe6   : > { %s4477_s8 = scalar_lea.vmem [#allocation2], %s4120_s2  ;;  %s4401_s10 = smov 112   ;;  %v315_v45 = vunpack.c.l.s4 %v4407_v44  ;;  %v379_v50 = vunpack.c.l.s4 %v4408_v49  ;;  %vm3986_vm1 = vcmask 261120   ;;  %vm3989_vm2 = vcmask 392192  }
  0xe7   : > { %s4402_s11 = smov 80   ;;  %s4403_s12 = smov 64   ;;  %v318_v52 = vshrl.u32 %v317_v46, 7  ;;  %vm3992_vm3 = vcmask 523264   ;;  %vm3995_vm4 = vcmask 654336   ;;  %vm4001_vm5 = vcmask 916480  }
  0xe8   : > { %s4404_s13 = smov 48   ;;  %s4405_s14 = smov 32   ;;  %v316_v51 = vunpack.c.0.s8 %v315_v45  ;;  %v380_v57 = vunpack.c.0.s8 %v379_v50  ;;  %vm3998_vm6 = vcmask 785408  }
  0xe9   : > { %s4406_s15 = smov 16   ;;  %s5406_s18 = scalar_lea.vmem %s5441_s3, %s4120_s2 }
  0xea   : > { %v4617_v58 = vsub.s32 %v316_v51, %v318_v52  ;;  %v4623_v5 = vsub.s32 %v380_v57, %v318_v52  ;;  %s212_s1 = sadd.s32 1, %s4396_s1  }
  0xeb   : > { %v4480_v36 = vld [vmem:[%s4477_s8] sm:$0xff]  ;;  %v4487_v37 = vld [vmem:[%s4477_s8 + $0x10] sm:$0xff]  ;;  %v4525_v39 = vld [vmem:[%s4477_s8 + $0x8] sm:$0xff]  ;;  %p209_p0 = scmp.ge.s32.totalorder %s212_s1, 2  }
  0xec   : > { %232 = vrot.lane.b32.xlu1 %v4480_v36, %s4400_s9  ;;  %226 = vrot.lane.b32.xlu0 %v4480_v36, %s4401_s10  ;;  %v4514_v38 = vmax.f32 %v4480_v36, 0.0  ;;  %v4532_v40 = vmax.f32 %v4525_v39, 0.0  ;;  %v4551_v41 = vld [vmem:[%s4477_s8 + $0x18] sm:$0xff]  ;;  %v4582_v42 = vmax.f32 %v4487_v37, 0.0 }
  0xed   : > { %v4597_v43 = vmax.f32 %v4551_v41, 0.0 }
  0xf0   : > { %234 = vrot.lane.b32.xlu1 %v4487_v37, %s4400_s9  ;;  %228 = vrot.lane.b32.xlu0 %v4487_v37, %s4401_s10 }
  0xf4   : > { %240 = vrot.lane.b32.xlu1 %v4487_v37, %s4402_s11  ;;  %238 = vrot.lane.b32.xlu0 %v4480_v36, %s4402_s11 }
  0xf8   : > { %246 = vrot.lane.b32.xlu1 %v4487_v37, %s4403_s12  ;;  %244 = vrot.lane.b32.xlu0 %v4480_v36, %s4403_s12 }
  0xfc   : > { %252 = vrot.lane.b32.xlu1 %v4487_v37, %s4404_s13  ;;  %250 = vrot.lane.b32.xlu0 %v4480_v36, %s4404_s13 }
 0x100   : > { %258 = vrot.lane.b32.xlu1 %v4487_v37, %s4405_s14  ;;  %256 = vrot.lane.b32.xlu0 %v4480_v36, %s4405_s14 }
 0x104   : > { %264 = vrot.lane.b32.xlu1 %v4487_v37, %s4406_s15  ;;  %262 = vrot.lane.b32.xlu0 %v4480_v36, %s4406_s15 }
 0x108   : > { %864 = vrot.lane.b32.xlu1 %v4514_v38, %s4400_s9  ;;  %858 = vrot.lane.b32.xlu0 %v4514_v38, %s4401_s10 }
 0x10c   : > { %876 = vrot.lane.b32.xlu1 %v4514_v38, %s4403_s12  ;;  %870 = vrot.lane.b32.xlu0 %v4514_v38, %s4402_s11 }
 0x110   : > { %888 = vrot.lane.b32.xlu1 %v4514_v38, %s4405_s14  ;;  %882 = vrot.lane.b32.xlu0 %v4514_v38, %s4404_s13 }
 0x114   : > { %902 = vrot.lane.b32.xlu1 %v4532_v40, %s4401_s10  ;;  %894 = vrot.lane.b32.xlu0 %v4514_v38, %s4406_s15 }
 0x118   : > { %914 = vrot.lane.b32.xlu1 %v4532_v40, %s4402_s11  ;;  %908 = vrot.lane.b32.xlu0 %v4532_v40, %s4400_s9 }
 0x11c   : > { %926 = vrot.lane.b32.xlu1 %v4532_v40, %s4404_s13  ;;  %920 = vrot.lane.b32.xlu0 %v4532_v40, %s4403_s12 }
 0x120   : > { %938 = vrot.lane.b32.xlu1 %v4532_v40, %s4406_s15  ;;  %932 = vrot.lane.b32.xlu0 %v4532_v40, %s4405_s14 }
 0x124   : > { %272 = vrot.lane.b32.xlu1 %v4551_v41, %s4401_s10  ;;  %270 = vrot.lane.b32.xlu0 %v4525_v39, %s4401_s10 }
 0x128   : > { %278 = vrot.lane.b32.xlu1 %v4551_v41, %s4400_s9  ;;  %276 = vrot.lane.b32.xlu0 %v4525_v39, %s4400_s9 }
 0x12c   : > { %284 = vrot.lane.b32.xlu1 %v4551_v41, %s4402_s11  ;;  %282 = vrot.lane.b32.xlu0 %v4525_v39, %s4402_s11 }
 0x130   : > { %290 = vrot.lane.b32.xlu1 %v4551_v41, %s4403_s12  ;;  %288 = vrot.lane.b32.xlu0 %v4525_v39, %s4403_s12 }
 0x134   : > { %296 = vrot.lane.b32.xlu1 %v4551_v41, %s4404_s13  ;;  %294 = vrot.lane.b32.xlu0 %v4525_v39, %s4404_s13 }
 0x138   : > { %302 = vrot.lane.b32.xlu1 %v4551_v41, %s4405_s14  ;;  %300 = vrot.lane.b32.xlu0 %v4525_v39, %s4405_s14 }
 0x13c   : > { %308 = vrot.lane.b32.xlu1 %v4551_v41, %s4406_s15  ;;  %306 = vrot.lane.b32.xlu0 %v4525_v39, %s4406_s15 }
 0x140   : > { %866 = vrot.lane.b32.xlu1 %v4582_v42, %s4400_s9  ;;  %860 = vrot.lane.b32.xlu0 %v4582_v42, %s4401_s10 }
 0x144   : > { %878 = vrot.lane.b32.xlu1 %v4582_v42, %s4403_s12  ;;  %872 = vrot.lane.b32.xlu0 %v4582_v42, %s4402_s11 }
 0x148   : > { %890 = vrot.lane.b32.xlu1 %v4582_v42, %s4405_s14  ;;  %884 = vrot.lane.b32.xlu0 %v4582_v42, %s4404_s13 }
 0x14c   : > { %904 = vrot.lane.b32.xlu1 %v4597_v43, %s4401_s10  ;;  %896 = vrot.lane.b32.xlu0 %v4582_v42, %s4406_s15 }
 0x150   : > { %916 = vrot.lane.b32.xlu1 %v4597_v43, %s4402_s11  ;;  %910 = vrot.lane.b32.xlu0 %v4597_v43, %s4400_s9 }
 0x154   : > { %928 = vrot.lane.b32.xlu1 %v4597_v43, %s4404_s13  ;;  %922 = vrot.lane.b32.xlu0 %v4597_v43, %s4403_s12 }
 0x158   : > { %940 = vrot.lane.b32.xlu1 %v4597_v43, %s4406_s15  ;;  %934 = vrot.lane.b32.xlu0 %v4597_v43, %s4405_s14 }
 0x15e   : > { %v233_v47 = vpop.permute.xlu1 %232  ;;  %v227_v48 = vpop.permute.xlu0 %226 }
 0x15f   : > { %v312_v59 = vcombine.low %v4480_v36, %v233_v47  ;;  %v313_v60 = vcombine.high %v4480_v36, %v233_v47 }
 0x161   : > { %v320_v10 = vrot.slane %v312_v59, %v4617_v58  ;;  %v327_v11 = vrot.slane %v313_v60, %v4617_v58 }
 0x162   : > { %v235_v53 = vpop.permute.xlu1 %234  ;;  %v229_v54 = vpop.permute.xlu0 %228 }
 0x163   : > { %v584_v55 = vcombine.low %v4487_v37, %v235_v53  ;;  %v585_v56 = vcombine.high %v4487_v37, %v235_v53 }
 0x165   : > { %v592_v3 = vrot.slane %v584_v55, %v4617_v58  ;;  %v599_v4 = vrot.slane %v585_v56, %v4617_v58 }
 0x166   : > { %v241_v61 = vpop.permute.xlu1 %240  ;;  %v239_v62 = vpop.permute.xlu0 %238 }
 0x167   : > { %v600_v63 = vcombine.low %v229_v54, %v241_v61  ;;  %v601_v0 = vcombine.high %v229_v54, %v241_v61  ;;  %v328_v1 = vcombine.low %v227_v48, %v239_v62  ;;  %v329_v2 = vcombine.high %v227_v48, %v239_v62 }
 0x169   : > { %v608_v6 = vrot.slane %v600_v63, %v4617_v58  ;;  %v615_v7 = vrot.slane %v601_v0, %v4617_v58  ;;  %v336_v8 = vrot.slane %v328_v1, %v4617_v58  ;;  %v343_v9 = vrot.slane %v329_v2, %v4617_v58 }
 0x16a   : > { %v247_v12 = vpop.permute.xlu1 %246  ;;  %v245_v13 = vpop.permute.xlu0 %244 }
 0x16b   : > { %v648_v14 = vcombine.low %v592_v3, %v608_v6  ;;  %v649_v15 = vcombine.high %v592_v3, %v608_v6  ;;  %v664_v16 = vcombine.low %v599_v4, %v615_v7  ;;  %v665_v17 = vcombine.high %v599_v4, %v615_v7 }
 0x16c   : > { %v376_v18 = vcombine.low %v320_v10, %v336_v8  ;;  %v377_v19 = vcombine.high %v320_v10, %v336_v8  ;;  %v392_v20 = vcombine.low %v327_v11, %v343_v9  ;;  %v393_v21 = vcombine.high %v327_v11, %v343_v9 }
 0x16d   : > { %v656_v22 = vrot.slane %v648_v14, %v4623_v5  ;;  %v663_v23 = vrot.slane %v649_v15, %v4623_v5  ;;  %v672_v24 = vrot.slane %v664_v16, %v4623_v5  ;;  %v679_v25 = vrot.slane %v665_v17, %v4623_v5 }
 0x16e   : > { %v384_v26 = vrot.slane %v376_v18, %v4623_v5  ;;  %v391_v27 = vrot.slane %v377_v19, %v4623_v5  ;;  %v400_v28 = vrot.slane %v392_v20, %v4623_v5  ;;  %v407_v29 = vrot.slane %v393_v21, %v4623_v5  ;;  %v253_v30 = vpop.permute.xlu1 %252  ;;  %v251_v31 = vpop.permute.xlu0 %250 }
 0x16f   : > { %v4063_v32 = vcombine.low %v656_v22, %v663_v23  ;;  %v4065_v33 = vcombine.high %v656_v22, %v663_v23  ;;  %v4067_v34 = vcombine.low %v672_v24, %v679_v25  ;;  %v4069_v35 = vcombine.high %v672_v24, %v679_v25 }
 0x170   : > { %v4055_v36 = vcombine.low %v384_v26, %v391_v27  ;;  %v4057_v37 = vcombine.high %v384_v26, %v391_v27  ;;  %v4059_v44 = vcombine.low %v400_v28, %v407_v29  ;;  %v4061_v45 = vcombine.high %v400_v28, %v407_v29 }
 0x171   : > { %v4640_v46 = vrot.slane %v4063_v32, %v4617_v58  ;;  %v4643_v47 = vrot.slane %v4065_v33, %v4617_v58  ;;  %v4646_v48 = vrot.slane %v4067_v34, %v4617_v58  ;;  %v4649_v49 = vrot.slane %v4069_v35, %v4617_v58 }
 0x172   : > { %v259_v50 = vpop.permute.xlu1 %258  ;;  %v257_v51 = vpop.permute.xlu0 %256  ;;  %v4652_v52 = vrot.slane %v4055_v36, %v4617_v58  ;;  %v4655_v53 = vrot.slane %v4057_v37, %v4617_v58  ;;  %v4658_v54 = vrot.slane %v4059_v44, %v4617_v58  ;;  %v4661_v55 = vrot.slane %v4061_v45, %v4617_v58 }
 0x173   : > { %v616_v56 = vcombine.low %v247_v12, %v259_v50  ;;  %v617_v57 = vcombine.high %v247_v12, %v259_v50  ;;  %v344_v59 = vcombine.low %v245_v13, %v257_v51  ;;  %v345_v60 = vcombine.high %v245_v13, %v257_v51 }
 0x174   : > { %v1552_v61 = vcombine.low %v4652_v52, %v4655_v53  ;;  %v1584_v62 = vcombine.low %v4658_v54, %v4661_v55  ;;  %v1688_v63 = vcombine.low %v4640_v46, %v4643_v47  ;;  %v1720_v0 = vcombine.low %v4646_v48, %v4649_v49 }
 0x175   : > { %v624_v1 = vrot.slane %v616_v56, %v4617_v58  ;;  %v631_v2 = vrot.slane %v617_v57, %v4617_v58  ;;  %v352_v3 = vrot.slane %v344_v59, %v4617_v58  ;;  %v359_v4 = vrot.slane %v345_v60, %v4617_v58 }
 0x176   : > { %v265_v6 = vpop.permute.xlu1 %264  ;;  %v263_v7 = vpop.permute.xlu0 %262  ;;  %v1560_v8 = vrot.slane %v1552_v61, %v4623_v5  ;;  %v1592_v9 = vrot.slane %v1584_v62, %v4623_v5  ;;  %v1696_v10 = vrot.slane %v1688_v63, %v4623_v5  ;;  %v1728_v11 = vrot.slane %v1720_v0, %v4623_v5 }
 0x177   : > { %v632_v12 = vcombine.low %v253_v30, %v265_v6  ;;  %v633_v13 = vcombine.high %v253_v30, %v265_v6  ;;  %v360_v14 = vcombine.low %v251_v31, %v263_v7  ;;  %v361_v15 = vcombine.high %v251_v31, %v263_v7 }
 0x178   : > { %v1616_v16 = vcombine.low %v1560_v8, %v1592_v9  ;;  %v1752_v17 = vcombine.low %v1696_v10, %v1728_v11  ;;  %v1617_v18 = vcombine.high %v1560_v8, %v1592_v9  ;;  %v1753_v19 = vcombine.high %v1696_v10, %v1728_v11 }
 0x179   : > { %v640_v20 = vrot.slane %v632_v12, %v4617_v58  ;;  %v647_v21 = vrot.slane %v633_v13, %v4617_v58  ;;  %v368_v22 = vrot.slane %v360_v14, %v4617_v58  ;;  %v375_v23 = vrot.slane %v361_v15, %v4617_v58 }
 0x17a   : > { %v4683_v24 = vpop.permute.xlu1 %864  ;;  %v4685_v25 = vpop.permute.xlu0 %858  ;;  %v4306_v26 = vpack.c.bf16 %v1752_v17, %v1616_v16  ;;  %v4310_v27 = vpack.c.bf16 %v1753_v19, %v1617_v18  ;;  %v1553_v28 = vcombine.high %v4652_v52, %v4655_v53  ;;  %v1585_v29 = vcombine.high %v4658_v54, %v4661_v55 }
 0x17b   : > { %v680_v30 = vcombine.low %v624_v1, %v640_v20  ;;  %v681_v31 = vcombine.high %v624_v1, %v640_v20  ;;  %v696_v32 = vcombine.low %v631_v2, %v647_v21  ;;  %v697_v33 = vcombine.high %v631_v2, %v647_v21 }
 0x17c   : > { %v408_v34 = vcombine.low %v352_v3, %v368_v22  ;;  %v409_v35 = vcombine.high %v352_v3, %v368_v22  ;;  %v424_v36 = vcombine.low %v359_v4, %v375_v23  ;;  %v425_v37 = vcombine.high %v359_v4, %v375_v23  ;;  %4307 = vmatprep.subr.bf16.mxu0 %v4306_v26 }
 0x17d   : > { %v688_v44 = vrot.slane %v680_v30, %v4623_v5  ;;  %v695_v45 = vrot.slane %v681_v31, %v4623_v5  ;;  %v704_v50 = vrot.slane %v696_v32, %v4623_v5  ;;  %v711_v51 = vrot.slane %v697_v33, %v4623_v5  ;;  %4311 = vmatprep.subr.bf16.mxu1 %v4310_v27 }
 0x17e   : > { %v416_v52 = vrot.slane %v408_v34, %v4623_v5  ;;  %v423_v53 = vrot.slane %v409_v35, %v4623_v5  ;;  %v432_v54 = vrot.slane %v424_v36, %v4623_v5  ;;  %v439_v55 = vrot.slane %v425_v37, %v4623_v5  ;;  %4309 = vmatpush3.bf16.msra.mxu0 %v4306_v26  ;;  %v877_v56 = vpop.permute.xlu1 %876  ;;  %v871_v57 = vpop.permute.xlu0 %870 }
 0x17f   : > { %v4064_v59 = vcombine.low %v688_v44, %v695_v45  ;;  %v4066_v60 = vcombine.high %v688_v44, %v695_v45  ;;  %v4068_v61 = vcombine.low %v704_v50, %v711_v51  ;;  %v4070_v62 = vcombine.high %v704_v50, %v711_v51  ;;  %4313 = vmatpush3.bf16.msra.mxu1 %v4310_v27 }
 0x180   : > { %v4056_v63 = vcombine.low %v416_v52, %v423_v53  ;;  %v4058_v0 = vcombine.high %v416_v52, %v423_v53  ;;  %v4060_v1 = vcombine.low %v432_v54, %v439_v55  ;;  %v4062_v6 = vcombine.high %v432_v54, %v439_v55 }
 0x181   : > { %v4700_v2 = vrot.slane %v4064_v59, %v4617_v58  ;;  %v4703_v3 = vrot.slane %v4066_v60, %v4617_v58  ;;  %v4706_v4 = vrot.slane %v4068_v61, %v4617_v58  ;;  %v4709_v9 = vrot.slane %v4070_v62, %v4617_v58 }
 0x182   : > { %v889_v7 = vpop.permute.xlu1 %888  ;;  %v883_v8 = vpop.permute.xlu0 %882  ;;  %v4712_v10 = vrot.slane %v4056_v63, %v4617_v58  ;;  %v1567_v11 = vrot.slane %v1553_v28, %v4623_v5  ;;  %v1599_v12 = vrot.slane %v1585_v29, %v4623_v5  ;;  %v944_v13 = vcombine.low %v4514_v38, %v4683_v24 }
 0x183   : > { %v1689_v14 = vcombine.high %v4640_v46, %v4643_v47  ;;  %v1721_v15 = vcombine.high %v4646_v48, %v4649_v49  ;;  %v960_v16 = vcombine.low %v4685_v25, %v871_v57  ;;  %v4724_v17 = vrot.slane %v4058_v0, %v4617_v58 }
 0x184   : > { %v4727_v18 = vrot.slane %v4060_v1, %v4617_v58  ;;  %v945_v19 = vcombine.high %v4514_v38, %v4683_v24  ;;  %v961_v20 = vcombine.high %v4685_v25, %v871_v57  ;;  %v1618_v21 = vcombine.low %v1567_v11, %v1599_v12 }
 0x185   : > { %v1703_v22 = vrot.slane %v1689_v14, %v4623_v5  ;;  %v1735_v46 = vrot.slane %v1721_v15, %v4623_v5  ;;  %v1619_v47 = vcombine.high %v1567_v11, %v1599_v12  ;;  %v4735_v23 = vrot.slane %v4062_v6, %v4617_v58 }
 0x186   : > { %v903_v48 = vpop.permute.xlu1 %902  ;;  %v895_v49 = vpop.permute.xlu0 %894  ;;  %v976_v26 = vcombine.low %v877_v56, %v889_v7  ;;  %v952_v29 = vrot.slane %v944_v13, %v4617_v58  ;;  %v968_v25 = vrot.slane %v960_v16, %v4617_v58  ;;  %v4740_v31 = vrot.slane %v945_v19, %v4617_v58 }
 0x187   : > { %v992_v27 = vcombine.low %v883_v8, %v895_v49  ;;  %v993_v28 = vcombine.high %v883_v8, %v895_v49  ;;  %v1754_v30 = vcombine.low %v1703_v22, %v1735_v46  ;;  %v1755_v24 = vcombine.high %v1703_v22, %v1735_v46 }
 0x188   : > { %v977_v32 = vcombine.high %v877_v56, %v889_v7  ;;  %v984_v33 = vrot.slane %v976_v26, %v4617_v58  ;;  %v4749_v37 = vrot.slane %v961_v20, %v4617_v58  ;;  %v1009_v55 = vcombine.high %v952_v29, %v968_v25 }
 0x189   : > { %v1000_v34 = vrot.slane %v992_v27, %v4617_v58  ;;  %v4744_v35 = vpack.c.bf16 %v1754_v30, %v1618_v21  ;;  %v4746_v36 = vpack.c.bf16 %v1755_v24, %v1619_v47  ;;  %v4752_v44 = vrot.slane %v993_v28, %v4617_v58 }
 0x18a   : > { %v915_v45 = vpop.permute.xlu1 %914  ;;  %v909_v50 = vpop.permute.xlu0 %908  ;;  %v1008_v57 = vcombine.low %v952_v29, %v968_v25  ;;  %v4759_v59 = vrot.slane %v977_v32, %v4617_v58  ;;  %v1024_v63 = vcombine.low %v4740_v31, %v4749_v37  ;;  %v1025_v11 = vcombine.high %v4740_v31, %v4749_v37 }
 0x18b   : > { %v1041_v51 = vcombine.high %v984_v33, %v1000_v34  ;;  %v1096_v52 = vcombine.low %v903_v48, %v915_v45  ;;  %v1097_v53 = vcombine.high %v903_v48, %v915_v45  ;;  %v1080_v54 = vcombine.low %v4532_v40, %v909_v50  ;;  %4315 = vmatprep.subr.bf16.mxu0 %v4744_v35 }
 0x18c   : > { %4319 = vmatprep.subr.bf16.mxu1 %v4746_v36  ;;  %v1081_v56 = vcombine.high %v4532_v40, %v909_v50  ;;  %v1040_v7 = vcombine.low %v984_v33, %v1000_v34  ;;  %v1056_v12 = vcombine.low %v4759_v59, %v4752_v44  ;;  %v1057_v13 = vcombine.high %v4759_v59, %v4752_v44 }
 0x18d   : > { %v1104_v60 = vrot.slane %v1096_v52, %v4617_v58  ;;  %v4763_v61 = vrot.slane %v1097_v53, %v4617_v58  ;;  %v1088_v62 = vrot.slane %v1080_v54, %v4617_v58  ;;  %v4772_v8 = vrot.slane %v1041_v51, %v4623_v5 }
 0x18e   : > { %v4769_v0 = vrot.slane %v1081_v56, %v4617_v58  ;;  %v927_v1 = vpop.permute.xlu1 %926  ;;  %v921_v6 = vpop.permute.xlu0 %920  ;;  %v1568_v14 = vcombine.low %v4712_v10, %v4724_v17  ;;  %v1016_v15 = vrot.slane %v1008_v57, %v4623_v5  ;;  %v1048_v16 = vrot.slane %v1040_v7, %v4623_v5 }
 0x18f   : > { %v4785_v19 = vrot.slane %v1009_v55, %v4623_v5  ;;  %v1600_v20 = vcombine.low %v4727_v18, %v4735_v23  ;;  %v1144_v21 = vcombine.low %v1088_v62, %v1104_v60  ;;  %v1145_v22 = vcombine.high %v1088_v62, %v1104_v60 }
 0x190   : > { %v1160_v46 = vcombine.low %v4769_v0, %v4763_v61  ;;  %v1161_v47 = vcombine.high %v4769_v0, %v4763_v61  ;;  %v1072_v48 = vcombine.low %v1016_v15, %v1048_v16  ;;  %v1073_v49 = vcombine.high %v1016_v15, %v1048_v16 }
 0x191   : > { %v1074_v28 = vcombine.low %v4785_v19, %v4772_v8  ;;  %v1576_v29 = vrot.slane %v1568_v14, %v4623_v5  ;;  %v1608_v33 = vrot.slane %v1600_v20, %v4623_v5  ;;  %v1704_v34 = vcombine.low %v4700_v2, %v4703_v3 }
 0x192   : > { %v939_v26 = vpop.permute.xlu1 %938  ;;  %v933_v27 = vpop.permute.xlu0 %932  ;;  %4190 = vmatprep.mubr.msk.f32.mxu0 %vm37_vm0, %v1072_v48  ;;  %4197 = vmatprep.mubr.msk.f32.mxu1 %vm37_vm0, %v1073_v49  ;;  %v1736_v45 = vcombine.low %v4706_v4, %v4709_v9  ;;  %v1152_v14 = vrot.slane %v1144_v21, %v4623_v5  ;;  %v1075_v15 = vcombine.high %v4785_v19, %v4772_v8 }
 0x193   : > { %v1128_v30 = vcombine.low %v927_v1, %v939_v26  ;;  %v1129_v24 = vcombine.high %v927_v1, %v939_v26  ;;  %v1112_v25 = vcombine.low %v921_v6, %v933_v27  ;;  %v1113_v32 = vcombine.high %v921_v6, %v933_v27 }
 0x194   : > { %v1620_v56 = vcombine.low %v1576_v29, %v1608_v33  ;;  %v1712_v57 = vrot.slane %v1704_v34, %v4623_v5  ;;  %v1744_v60 = vrot.slane %v1736_v45, %v4623_v5  ;;  %v1621_v62 = vcombine.high %v1576_v29, %v1608_v33 }
 0x195   : > { %v1136_v50 = vrot.slane %v1128_v30, %v4617_v58  ;;  %v4805_v51 = vrot.slane %v1129_v24, %v4617_v58  ;;  %v1120_v52 = vrot.slane %v1112_v25, %v4617_v58  ;;  %v4809_v53 = vrot.slane %v1113_v32, %v4617_v58 }
 0x196   : > { %v273_v54 = vpop.permute.xlu1 %272  ;;  %v271_v55 = vpop.permute.xlu0 %270  ;;  %v1159_v1 = vrot.slane %v1145_v22, %v4623_v5  ;;  %v1756_v16 = vcombine.low %v1712_v57, %v1744_v60  ;;  %v1757_v20 = vcombine.high %v1712_v57, %v1744_v60  ;;  %v4818_v48 = vrot.slane %v1056_v12, %v4623_v5 }
 0x197   : > { %v1176_v6 = vcombine.low %v1120_v52, %v1136_v50  ;;  %v1177_v7 = vcombine.high %v1120_v52, %v1136_v50  ;;  %v4821_v49 = vrot.slane %v1160_v46, %v4623_v5  ;;  %v4826_v22 = vrot.slane %v1024_v63, %v4623_v5 }
 0x198   : > { %v1192_v21 = vcombine.low %v4809_v53, %v4805_v51  ;;  %v1193_v29 = vcombine.high %v4809_v53, %v4805_v51  ;;  %v4322_v12 = vpack.c.bf16 %v1756_v16, %v1620_v56  ;;  %v4326_v25 = vpack.c.bf16 %v1757_v20, %v1621_v62 }
 0x199   : > { %v1191_v26 = vrot.slane %v1177_v7, %v4623_v5  ;;  %v1184_v27 = vrot.slane %v1176_v6, %v4623_v5  ;;  %v1076_v63 = vcombine.low %v4826_v22, %v4818_v48  ;;  %v1077_v52 = vcombine.high %v4826_v22, %v4818_v48 }
 0x19a   : > { %v279_v30 = vpop.permute.xlu1 %278  ;;  %v277_v24 = vpop.permute.xlu0 %276 }
 0x19b   : > { %v720_v46 = vcombine.low %v4551_v41, %v279_v30  ;;  %v721_v32 = vcombine.high %v4551_v41, %v279_v30  ;;  %v448_v33 = vcombine.low %v4525_v39, %v277_v24  ;;  %v449_v34 = vcombine.high %v4525_v39, %v277_v24 }
 0x19c   : > { %v1208_v45 = vcombine.low %v1152_v14, %v1184_v27  ;;  %v1209_v50 = vcombine.high %v1152_v14, %v1184_v27  ;;  %v1210_v60 = vcombine.low %v1159_v1, %v1191_v26  ;;  %v1211_v62 = vcombine.high %v1159_v1, %v1191_v26 }
 0x19d   : > { %v728_v57 = vrot.slane %v720_v46, %v4617_v58  ;;  %v735_v56 = vrot.slane %v721_v32, %v4617_v58  ;;  %v456_v41 = vrot.slane %v448_v33, %v4617_v58  ;;  %v1569_v39 = vcombine.high %v4712_v10, %v4724_v17 }
 0x19e   : > { %4191 = vmatmul.mubr.msk.f32.vlgmr.msra.gmra.mrb[0].mxu0 %vm37_vm0, %v1208_v45  ;;  %4198 = vmatmul.mubr.msk.f32.vlgmr.msra.gmra.mrb[0].mxu1 %vm37_vm0, %v1209_v50  ;;  %v285_v6 = vpop.permute.xlu1 %284  ;;  %v283_v7 = vpop.permute.xlu0 %282  ;;  %v1601_v14 = vcombine.high %v4727_v18, %v4735_v23  ;;  %v463_v48 = vrot.slane %v449_v34, %v4617_v58  ;;  %v1705_v17 = vcombine.high %v4700_v2, %v4703_v3 }
 0x19f   : > { %4317 = vmatpush3.bf16.msra.mxu0 %v4744_v35  ;;  %4321 = vmatpush3.bf16.msra.mxu1 %v4746_v36  ;;  %v736_v16 = vcombine.low %v273_v54, %v285_v6  ;;  %v737_v1 = vcombine.high %v273_v54, %v285_v6  ;;  %v464_v20 = vcombine.low %v271_v55, %v283_v7 }
 0x1a0   : > { %4204 = vmatprep.mubr.msk.f32.mxu0 %vm37_vm0, %v1074_v28  ;;  %4211 = vmatprep.mubr.msk.f32.mxu1 %vm37_vm0, %v1075_v15  ;;  %v465_v10 = vcombine.high %v271_v55, %v283_v7  ;;  %v4868_v19 = vrot.slane %v1569_v39, %v4623_v5  ;;  %v4871_v2 = vrot.slane %v1601_v14, %v4623_v5 }
 0x1a1   : > { %v744_v18 = vrot.slane %v736_v16, %v4617_v58  ;;  %v751_v23 = vrot.slane %v737_v1, %v4617_v58  ;;  %4323 = vmatprep.subr.bf16.mxu0 %v4322_v12  ;;  %4327 = vmatprep.subr.bf16.mxu1 %v4326_v25  ;;  %v472_v35 = vrot.slane %v464_v20, %v4617_v58 }
 0x1a2   : > { %v479_v36 = vrot.slane %v465_v10, %v4617_v58  ;;  %4205 = vmatmul.mubr.msk.f32.vlgmr.msra.gmra.mrb[2].mxu0 %vm37_vm0, %v1210_v60  ;;  %4212 = vmatmul.mubr.msk.f32.vlgmr.msra.gmra.mrb[2].mxu1 %vm37_vm0, %v1211_v62  ;;  %v4865_v8 = vpop.permute.xlu1 %290  ;;  %v4873_v3 = vpop.permute.xlu0 %288  ;;  %v4909_v60 = vrot.slane %v1193_v29, %v4623_v5  ;;  %v1719_v51 = vrot.slane %v1705_v17, %v4623_v5 }
 0x1a3   : > { %v784_v28 = vcombine.low %v728_v57, %v744_v18  ;;  %v785_v54 = vcombine.high %v728_v57, %v744_v18  ;;  %v800_v55 = vcombine.low %v735_v56, %v751_v23  ;;  %v801_v15 = vcombine.high %v735_v56, %v751_v23  ;;  %4325 = vmatpush3.bf16.msra.mxu0 %v4322_v12 }
 0x1a4   : > { %v512_v26 = vcombine.low %v456_v41, %v472_v35  ;;  %v513_v27 = vcombine.high %v456_v41, %v472_v35  ;;  %v528_v22 = vcombine.low %v463_v48, %v479_v36  ;;  %v529_v30 = vcombine.high %v463_v48, %v479_v36  ;;  %4329 = vmatpush3.bf16.msra.mxu1 %v4326_v25 }
 0x1a5   : > { %v4876_v24 = vrot.slane %v784_v28, %v4623_v5  ;;  %v4879_v46 = vrot.slane %v785_v54, %v4623_v5  ;;  %v4882_v32 = vrot.slane %v800_v55, %v4623_v5  ;;  %v4885_v33 = vrot.slane %v801_v15, %v4623_v5  ;;  %4218 = vmatprep.mubr.msk.f32.mxu0 %vm37_vm0, %v1076_v63 }
 0x1a6   : > { %v520_v12 = vrot.slane %v512_v26, %v4623_v5  ;;  %v527_v34 = vrot.slane %v513_v27, %v4623_v5  ;;  %v536_v25 = vrot.slane %v528_v22, %v4623_v5  ;;  %v543_v45 = vrot.slane %v529_v30, %v4623_v5  ;;  %4225 = vmatprep.mubr.msk.f32.mxu1 %vm37_vm0, %v1077_v52  ;;  %v297_v50 = vpop.permute.xlu1 %296  ;;  %v4893_v57 = vpop.permute.xlu0 %294 }
 0x1a7   : > { %v4899_v56 = vrot.slane %v1161_v47, %v4623_v5  ;;  %v1200_v63 = vrot.slane %v1192_v21, %v4623_v5  ;;  %v4079_v52 = vcombine.low %v4876_v24, %v4879_v46  ;;  %v4081_v0 = vcombine.high %v4876_v24, %v4879_v46 }
 0x1a8   : > { %v4071_v62 = vcombine.low %v520_v12, %v527_v34  ;;  %v4073_v41 = vcombine.high %v520_v12, %v527_v34  ;;  %v4075_v6 = vcombine.low %v536_v25, %v543_v45  ;;  %v4077_v61 = vcombine.high %v536_v25, %v543_v45 }
 0x1a9   : > { %v4083_v47 = vcombine.low %v4882_v32, %v4885_v33  ;;  %v1622_v21 = vcombine.low %v4868_v19, %v4871_v2  ;;  %v4921_v53 = vrot.slane %v4079_v52, %v4617_v58  ;;  %v4085_v29 = vcombine.high %v4882_v32, %v4885_v33 }
 0x1aa   : > { %v4926_v7 = vrot.slane %v4071_v62, %v4617_v58  ;;  %v4929_v39 = vrot.slane %v4073_v41, %v4617_v58  ;;  %v303_v14 = vpop.permute.xlu1 %302  ;;  %v301_v16 = vpop.permute.xlu0 %300  ;;  %v4932_v1 = vrot.slane %v4075_v6, %v4617_v58  ;;  %v1737_v20 = vcombine.high %v4706_v4, %v4709_v9 }
 0x1ab   : > { %v1212_v48 = vcombine.low %v4821_v49, %v1200_v63  ;;  %v1213_v10 = vcombine.high %v4821_v49, %v1200_v63  ;;  %v4939_v17 = vrot.slane %v4077_v61, %v4617_v58  ;;  %v1623_v18 = vcombine.high %v4868_v19, %v4871_v2 }
 0x1ac   : > { %v1039_v23 = vrot.slane %v1025_v11, %v4623_v5  ;;  %v1071_v4 = vrot.slane %v1057_v13, %v4623_v5  ;;  %v1751_v9 = vrot.slane %v1737_v20, %v4623_v5  ;;  %v752_v49 = vcombine.low %v4865_v8, %v303_v14 }
 0x1ad   : > { %4219 = vmatmul.mubr.msk.f32.vlgmr.msra.gmra.mrb[4].mxu0 %vm37_vm0, %v1212_v48  ;;  %4226 = vmatmul.mubr.msk.f32.vlgmr.msra.gmra.mrb[4].mxu1 %vm37_vm0, %v1213_v10  ;;  %v753_v35 = vcombine.high %v4865_v8, %v303_v14  ;;  %v480_v31 = vcombine.low %v4873_v3, %v301_v16  ;;  %v481_v37 = vcombine.high %v4873_v3, %v301_v16 }
 0x1ae   : > { %v1078_v36 = vcombine.low %v1039_v23, %v1071_v4  ;;  %v1079_v19 = vcombine.high %v1039_v23, %v1071_v4  ;;  %v309_v11 = vpop.permute.xlu1 %308  ;;  %v307_v2 = vpop.permute.xlu0 %306  ;;  %v1758_v44 = vcombine.low %v1719_v51, %v1751_v9  ;;  %v1759_v59 = vcombine.high %v1719_v51, %v1751_v9 }
 0x1af   : > { %v1214_v13 = vcombine.low %v4899_v56, %v4909_v60  ;;  %v1215_v28 = vcombine.high %v4899_v56, %v4909_v60  ;;  %v760_v8 = vrot.slane %v752_v49, %v4617_v58  ;;  %v767_v54 = vrot.slane %v753_v35, %v4617_v58 }
 0x1b0   : > { %4232 = vmatprep.mubr.msk.f32.mxu0 %vm37_vm0, %v1078_v36  ;;  %4239 = vmatprep.mubr.msk.f32.mxu1 %vm37_vm0, %v1079_v19  ;;  %v768_v55 = vcombine.low %v297_v50, %v309_v11  ;;  %v4330_v3 = vpack.c.bf16 %v1758_v44, %v1622_v21  ;;  %v4334_v15 = vpack.c.bf16 %v1759_v59, %v1623_v18 }
 0x1b1   : > { %v769_v26 = vcombine.high %v297_v50, %v309_v11  ;;  %v496_v27 = vcombine.low %v4893_v57, %v307_v2  ;;  %v488_v22 = vrot.slane %v480_v31, %v4617_v58  ;;  %v495_v30 = vrot.slane %v481_v37, %v4617_v58 }
 0x1b2   : > { %v776_v12 = vrot.slane %v768_v55, %v4617_v58  ;;  %v497_v34 = vcombine.high %v4893_v57, %v307_v2  ;;  %v4971_v25 = vpop.permute.xlu1 %866  ;;  %v4973_v45 = vpop.permute.xlu0 %860  ;;  %4331 = vmatprep.subr.bf16.mxu0 %v4330_v3  ;;  %4335 = vmatprep.subr.bf16.mxu1 %v4334_v15  ;;  %v1824_v63 = vcombine.low %v4926_v7, %v4929_v39 }
 0x1b3   : > { %v783_v56 = vrot.slane %v769_v26, %v4617_v58  ;;  %v504_v50 = vrot.slane %v496_v27, %v4617_v58  ;;  %4333 = vmatpush3.bf16.msra.mxu0 %v4330_v3  ;;  %4337 = vmatpush3.bf16.msra.mxu1 %v4334_v15  ;;  %v1856_v37 = vcombine.low %v4932_v1, %v4939_v17 }
 0x1b4   : > { %v816_v60 = vcombine.low %v760_v8, %v776_v12  ;;  %v817_v52 = vcombine.high %v760_v8, %v776_v12  ;;  %v511_v62 = vrot.slane %v497_v34, %v4617_v58  ;;  %v1920_v11 = vrot.slane %v4081_v0, %v4617_v58 }
 0x1b5   : > { %v832_v57 = vcombine.low %v767_v54, %v783_v56  ;;  %v833_v41 = vcombine.high %v767_v54, %v783_v56  ;;  %v544_v6 = vcombine.low %v488_v22, %v504_v50  ;;  %v545_v61 = vcombine.high %v488_v22, %v504_v50 }
 0x1b6   : > { %v824_v21 = vrot.slane %v816_v60, %v4623_v5  ;;  %v831_v51 = vrot.slane %v817_v52, %v4623_v5  ;;  %v560_v14 = vcombine.low %v495_v30, %v511_v62  ;;  %v561_v16 = vcombine.high %v495_v30, %v511_v62  ;;  %v4982_v20 = vpop.permute.xlu1 %878  ;;  %v4984_v48 = vpop.permute.xlu0 %872  ;;  %4233 = vmatmul.mubr.msk.f32.vlgmr.msra.gmra.mrb[6].mxu0 %vm37_vm0, %v1214_v13 }
 0x1b7   : > { %4240 = vmatmul.mubr.msk.f32.vlgmr.msra.gmra.mrb[6].mxu1 %vm37_vm0, %v1215_v28  ;;  %v840_v10 = vrot.slane %v832_v57, %v4623_v5  ;;  %v847_v18 = vrot.slane %v833_v41, %v4623_v5  ;;  %v552_v23 = vrot.slane %v544_v6, %v4623_v5  ;;  %v559_v49 = vrot.slane %v545_v61, %v4623_v5 }
 0x1b8   : > { %v4080_v4 = vcombine.low %v824_v21, %v831_v51  ;;  %v4082_v9 = vcombine.high %v824_v21, %v831_v51  ;;  %v568_v35 = vrot.slane %v560_v14, %v4623_v5  ;;  %v575_v31 = vrot.slane %v561_v16, %v4623_v5 }
 0x1b9   : > { %v4084_v36 = vcombine.low %v840_v10, %v847_v18  ;;  %v4086_v19 = vcombine.high %v840_v10, %v847_v18  ;;  %v1936_v2 = vrot.slane %v4083_v47, %v4617_v58  ;;  %v1952_v44 = vrot.slane %v4085_v29, %v4617_v58 }
 0x1ba   : > { %v4072_v59 = vcombine.low %v552_v23, %v559_v49  ;;  %v5008_v13 = vpop.permute.xlu1 %890  ;;  %v5010_v28 = vpop.permute.xlu0 %884  ;;  %v5013_v8 = vrot.slane %v4080_v4, %v4617_v58  ;;  %v5016_v24 = vrot.slane %v4082_v9, %v4617_v58  ;;  %v1216_v46 = vcombine.low %v4582_v42, %v4971_v25 }
 0x1bb   : > { %v1217_v0 = vcombine.high %v4582_v42, %v4971_v25  ;;  %v5023_v32 = vrot.slane %v4084_v36, %v4617_v58  ;;  %v5026_v33 = vrot.slane %v4086_v19, %v4617_v58  ;;  %v4074_v47 = vcombine.high %v552_v23, %v559_v49 }
 0x1bc   : > { %v4076_v29 = vcombine.low %v568_v35, %v575_v31  ;;  %v5029_v54 = vrot.slane %v4072_v59, %v4617_v58  ;;  %v4078_v55 = vcombine.high %v568_v35, %v575_v31  ;;  %v1832_v3 = vrot.slane %v1824_v63, %v4623_v5 }
 0x1bd   : > { %v1864_v15 = vrot.slane %v1856_v37, %v4623_v5  ;;  %v1960_v26 = vcombine.low %v4921_v53, %v1920_v11  ;;  %v1992_v27 = vcombine.low %v1936_v2, %v1952_v44  ;;  %v1825_v22 = vcombine.high %v4926_v7, %v4929_v39 }
 0x1be   : > { %v1857_v30 = vcombine.high %v4932_v1, %v4939_v17  ;;  %v5038_v12 = vpop.permute.xlu1 %904  ;;  %v897_v34 = vpop.permute.xlu0 %896  ;;  %v1961_v50 = vcombine.high %v4921_v53, %v1920_v11  ;;  %v1993_v60 = vcombine.high %v1936_v2, %v1952_v44  ;;  %v1232_v1 = vcombine.low %v4973_v45, %v4984_v48 }
 0x1bf   : > { %v1888_v25 = vcombine.low %v1832_v3, %v1864_v15  ;;  %v1889_v56 = vcombine.high %v1832_v3, %v1864_v15  ;;  %v1968_v63 = vrot.slane %v1960_v26, %v4623_v5  ;;  %v2000_v52 = vrot.slane %v1992_v27, %v4623_v5 }
 0x1c0   : > { %v1839_v62 = vrot.slane %v1825_v22, %v4623_v5  ;;  %v1871_v57 = vrot.slane %v1857_v30, %v4623_v5  ;;  %v1975_v7 = vrot.slane %v1961_v50, %v4623_v5  ;;  %v2007_v39 = vrot.slane %v1993_v60, %v4623_v5 }
 0x1c1   : > { %v1233_v17 = vcombine.high %v4973_v45, %v4984_v48  ;;  %v2024_v53 = vcombine.low %v1968_v63, %v2000_v52  ;;  %v2025_v41 = vcombine.high %v1968_v63, %v2000_v52  ;;  %v5052_v14 = vrot.slane %v4074_v47, %v4617_v58 }
 0x1c2   : > { %v1890_v6 = vcombine.low %v1839_v62, %v1871_v57  ;;  %v1891_v61 = vcombine.high %v1839_v62, %v1871_v57  ;;  %v917_v21 = vpop.permute.xlu1 %916  ;;  %v911_v51 = vpop.permute.xlu0 %910  ;;  %v2026_v16 = vcombine.low %v1975_v7, %v2007_v39  ;;  %v2027_v10 = vcombine.high %v1975_v7, %v2007_v39 }
 0x1c3   : > { %v1240_v18 = vrot.slane %v1232_v1, %v4617_v58  ;;  %v1224_v23 = vrot.slane %v1216_v46, %v4617_v58  ;;  %v5057_v4 = vrot.slane %v1217_v0, %v4617_v58  ;;  %v4338_v9 = vpack.c.bf16 %v2024_v53, %v1888_v25 }
 0x1c4   : > { %v4342_v45 = vpack.c.bf16 %v2025_v41, %v1889_v56  ;;  %v5060_v48 = vrot.slane %v4076_v29, %v4617_v58  ;;  %v5063_v49 = vrot.slane %v4078_v55, %v4617_v58  ;;  %v5066_v35 = vrot.slane %v1233_v17, %v4617_v58 }
 0x1c5   : > { %v1248_v36 = vcombine.low %v4982_v20, %v5008_v13  ;;  %4339 = vmatprep.subr.bf16.mxu0 %v4338_v9  ;;  %v5070_v19 = vpack.c.bf16 %v2026_v16, %v1890_v6  ;;  %v5072_v31 = vpack.c.bf16 %v2027_v10, %v1891_v61  ;;  %v1249_v37 = vcombine.high %v4982_v20, %v5008_v13 }
 0x1c6   : > { %4343 = vmatprep.subr.bf16.mxu1 %v4342_v45  ;;  %v929_v11 = vpop.permute.xlu1 %928  ;;  %v923_v2 = vpop.permute.xlu0 %922  ;;  %4341 = vmatpush3.bf16.msra.mxu0 %v4338_v9  ;;  %v1280_v44 = vcombine.low %v1224_v23, %v1240_v18  ;;  %v1264_v59 = vcombine.low %v5010_v28, %v897_v34  ;;  %v1265_v46 = vcombine.high %v5010_v28, %v897_v34 }
 0x1c7   : > { %4345 = vmatpush3.bf16.msra.mxu1 %v4342_v45  ;;  %4347 = vmatprep.subr.bf16.mxu0 %v5070_v19  ;;  %v1368_v0 = vcombine.low %v5038_v12, %v917_v21  ;;  %v1369_v47 = vcombine.high %v5038_v12, %v917_v21  ;;  %v1352_v29 = vcombine.low %v4597_v43, %v911_v51 }
 0x1c8   : > { %4351 = vmatprep.subr.bf16.mxu1 %v5072_v31  ;;  %v1281_v20 = vcombine.high %v1224_v23, %v1240_v18  ;;  %v1256_v13 = vrot.slane %v1248_v36, %v4617_v58  ;;  %v1272_v55 = vrot.slane %v1264_v59, %v4617_v58  ;;  %v1353_v3 = vcombine.high %v4597_v43, %v911_v51 }
 0x1c9   : > { %v1296_v28 = vcombine.low %v5057_v4, %v5066_v35  ;;  %v5089_v15 = vrot.slane %v1265_v46, %v4617_v58  ;;  %v1376_v26 = vrot.slane %v1368_v0, %v4617_v58  ;;  %v1360_v27 = vrot.slane %v1352_v29, %v4617_v58 }
 0x1ca   : > { %v941_v22 = vpop.permute.xlu1 %940  ;;  %v935_v30 = vpop.permute.xlu0 %934  ;;  %v1297_v12 = vcombine.high %v5057_v4, %v5066_v35  ;;  %v5096_v34 = vrot.slane %v1249_v37, %v4617_v58  ;;  %v1312_v25 = vcombine.low %v1256_v13, %v1272_v55  ;;  %v1288_v56 = vrot.slane %v1280_v44, %v4623_v5 }
 0x1cb   : > { %v1313_v50 = vcombine.high %v1256_v13, %v1272_v55  ;;  %v5100_v60 = vrot.slane %v1369_v47, %v4617_v58  ;;  %v5103_v63 = vrot.slane %v1353_v3, %v4617_v58  ;;  %v1400_v52 = vcombine.low %v929_v11, %v941_v22 }
 0x1cc   : > { %v1320_v62 = vrot.slane %v1312_v25, %v4623_v5  ;;  %v1401_v57 = vcombine.high %v929_v11, %v941_v22  ;;  %v1384_v7 = vcombine.low %v923_v2, %v935_v30  ;;  %v1385_v39 = vcombine.high %v923_v2, %v935_v30 }
 0x1cd   : > { %v1328_v1 = vcombine.low %v5096_v34, %v5089_v15  ;;  %v1416_v17 = vcombine.low %v1360_v27, %v1376_v26  ;;  %v1417_v53 = vcombine.high %v1360_v27, %v1376_v26  ;;  %v1295_v41 = vrot.slane %v1281_v20, %v4623_v5 }
 0x1ce   : > { %v1344_v6 = vcombine.low %v1288_v56, %v1320_v62  ;;  %v1345_v61 = vcombine.high %v1288_v56, %v1320_v62  ;;  %v1408_v21 = vrot.slane %v1400_v52, %v4617_v58  ;;  %v5111_v51 = vrot.slane %v1401_v57, %v4617_v58 }
 0x1cf   : > { %v1329_v16 = vcombine.high %v5096_v34, %v5089_v15  ;;  %v1432_v10 = vcombine.low %v5103_v63, %v5100_v60  ;;  %v1392_v18 = vrot.slane %v1384_v7, %v4617_v58  ;;  %v5119_v23 = vrot.slane %v1385_v39, %v4617_v58 }
 0x1d0   : > { %4246 = vmatprep.mubr.msk.f32.mxu0 %vm37_vm0, %v1344_v6  ;;  %4253 = vmatprep.mubr.msk.f32.mxu1 %vm37_vm0, %v1345_v61  ;;  %v1327_v9 = vrot.slane %v1313_v50, %v4623_v5  ;;  %v1840_v45 = vcombine.low %v5029_v54, %v5052_v14  ;;  %v1872_v36 = vcombine.low %v5060_v48, %v5063_v49 }
 0x1d1   : > { %v1424_v37 = vrot.slane %v1416_v17, %v4623_v5  ;;  %v1448_v11 = vcombine.low %v1392_v18, %v1408_v21  ;;  %v1449_v2 = vcombine.high %v1392_v18, %v1408_v21  ;;  %v1464_v44 = vcombine.low %v5119_v23, %v5111_v51 }
 0x1d2   : > { %v1431_v59 = vrot.slane %v1417_v53, %v4623_v5  ;;  %v1433_v46 = vcombine.high %v5103_v63, %v5100_v60  ;;  %v1848_v0 = vrot.slane %v1840_v45, %v4623_v5  ;;  %v1880_v47 = vrot.slane %v1872_v36, %v4623_v5 }
 0x1d3   : > { %v1440_v29 = vrot.slane %v1432_v10, %v4623_v5  ;;  %v1456_v20 = vrot.slane %v1448_v11, %v4623_v5  ;;  %v1463_v13 = vrot.slane %v1449_v2, %v4623_v5  ;;  %v1346_v55 = vcombine.low %v1295_v41, %v1327_v9 }
 0x1d4   : > { %v1472_v3 = vrot.slane %v1464_v44, %v4623_v5  ;;  %v1347_v26 = vcombine.high %v1295_v41, %v1327_v9  ;;  %v1976_v27 = vcombine.low %v5013_v8, %v5016_v24  ;;  %v2008_v22 = vcombine.low %v5023_v32, %v5026_v33 }
 0x1d5   : > { %v1480_v30 = vcombine.low %v1424_v37, %v1456_v20  ;;  %v1481_v25 = vcombine.high %v1424_v37, %v1456_v20  ;;  %v1892_v56 = vcombine.low %v1848_v0, %v1880_v47  ;;  %v1893_v50 = vcombine.high %v1848_v0, %v1880_v47 }
 0x1d6   : > { %v1984_v52 = vrot.slane %v1976_v27, %v4623_v5  ;;  %v2016_v62 = vrot.slane %v2008_v22, %v4623_v5  ;;  %v1482_v57 = vcombine.low %v1431_v59, %v1463_v13  ;;  %v1336_v7 = vrot.slane %v1328_v1, %v4623_v5 }
 0x1d7   : > { %4247 = vmatmul.mubr.msk.f32.vlgmr.msra.gmra.mrb[8].mxu0 %vm37_vm0, %v1480_v30  ;;  %4254 = vmatmul.mubr.msk.f32.vlgmr.msra.gmra.mrb[8].mxu1 %vm37_vm0, %v1481_v25  ;;  %v1841_v39 = vcombine.high %v5029_v54, %v5052_v14  ;;  %v1873_v17 = vcombine.high %v5060_v48, %v5063_v49  ;;  %v1977_v53 = vcombine.high %v5013_v8, %v5016_v24 }
 0x1d8   : > { %4349 = vmatpush3.bf16.msra.mxu0 %v5070_v19  ;;  %4353 = vmatpush3.bf16.msra.mxu1 %v5072_v31  ;;  %v2028_v41 = vcombine.low %v1984_v52, %v2016_v62  ;;  %v2029_v6 = vcombine.high %v1984_v52, %v2016_v62  ;;  %v1483_v1 = vcombine.high %v1431_v59, %v1463_v13 }
 0x1d9   : > { %4260 = vmatprep.mubr.msk.f32.mxu0 %vm37_vm0, %v1346_v55  ;;  %4267 = vmatprep.mubr.msk.f32.mxu1 %vm37_vm0, %v1347_v26  ;;  %v1304_v54 = vrot.slane %v1296_v28, %v4623_v5  ;;  %v1855_v14 = vrot.slane %v1841_v39, %v4623_v5  ;;  %v1887_v8 = vrot.slane %v1873_v17, %v4623_v5 }
 0x1da   : > { %v4354_v24 = vpack.c.bf16 %v2028_v41, %v1892_v56  ;;  %v4358_v48 = vpack.c.bf16 %v2029_v6, %v1893_v50  ;;  %v1991_v49 = vrot.slane %v1977_v53, %v4623_v5  ;;  %v2009_v19 = vcombine.high %v5023_v32, %v5026_v33 }
 0x1db   : > { %v1465_v31 = vcombine.high %v5119_v23, %v5111_v51  ;;  %4261 = vmatmul.mubr.msk.f32.vlgmr.msra.gmra.mrb[10].mxu0 %vm37_vm0, %v1482_v57  ;;  %4268 = vmatmul.mubr.msk.f32.vlgmr.msra.gmra.mrb[10].mxu1 %vm37_vm0, %v1483_v1  ;;  %v1348_v61 = vcombine.low %v1304_v54, %v1336_v7  ;;  %v1349_v28 = vcombine.high %v1304_v54, %v1336_v7 }
 0x1dc   : > { %4355 = vmatprep.subr.bf16.mxu0 %v4354_v24  ;;  %4359 = vmatprep.subr.bf16.mxu1 %v4358_v48  ;;  %v1894_v21 = vcombine.low %v1855_v14, %v1887_v8  ;;  %v2023_v10 = vrot.slane %v2009_v19, %v4623_v5  ;;  %v1895_v18 = vcombine.high %v1855_v14, %v1887_v8 }
 0x1dd   : > { %4357 = vmatpush3.bf16.msra.mxu0 %v4354_v24  ;;  %4361 = vmatpush3.bf16.msra.mxu1 %v4358_v48  ;;  %v1484_v9 = vcombine.low %v1440_v29, %v1472_v3  ;;  %v1311_v32 = vrot.slane %v1297_v12, %v4623_v5  ;;  %v1343_v33 = vrot.slane %v1329_v16, %v4623_v5 }
 0x1de   : > { %4274 = vmatprep.mubr.msk.f32.mxu0 %vm37_vm0, %v1348_v61  ;;  %4281 = vmatprep.mubr.msk.f32.mxu1 %vm37_vm0, %v1349_v28  ;;  %v2030_v51 = vcombine.low %v1991_v49, %v2023_v10  ;;  %v2031_v23 = vcombine.high %v1991_v49, %v2023_v10  ;;  %v1485_v45 = vcombine.high %v1440_v29, %v1472_v3 }
 0x1df   : > { %v1350_v36 = vcombine.low %v1311_v32, %v1343_v33  ;;  %v1351_v37 = vcombine.high %v1311_v32, %v1343_v33  ;;  %v1479_v11 = vrot.slane %v1465_v31, %v4623_v5  ;;  %v1447_v4 = vrot.slane %v1433_v46, %v4623_v5 }
 0x1e0   : > { %v4362_v2 = vpack.c.bf16 %v2030_v51, %v1894_v21  ;;  %v4366_v44 = vpack.c.bf16 %v2031_v23, %v1895_v18  ;;  %4275 = vmatmul.mubr.msk.f32.vlgmr.msra.gmra.mrb[12].mxu0 %vm37_vm0, %v1484_v9  ;;  %4282 = vmatmul.mubr.msk.f32.vlgmr.msra.gmra.mrb[12].mxu1 %vm37_vm0, %v1485_v45 }
 0x1e1   : > { %4288 = vmatprep.mubr.msk.f32.mxu0 %vm37_vm0, %v1350_v36  ;;  %4295 = vmatprep.mubr.msk.f32.mxu1 %vm37_vm0, %v1351_v37  ;;  %v1486_v35 = vcombine.low %v1447_v4, %v1479_v11  ;;  %v1487_v15 = vcombine.high %v1447_v4, %v1479_v11 }
 0x1e2   : > { %4363 = vmatprep.subr.bf16.mxu0 %v4362_v2  ;;  %4367 = vmatprep.subr.bf16.mxu1 %v4366_v44 }
 0x1e3   : > { %4365 = vmatpush3.bf16.msra.mxu0 %v4362_v2  ;;  %4369 = vmatpush3.bf16.msra.mxu1 %v4366_v44 }
 0x1e6   : > { %4289 = vmatmul.mubr.msk.f32.vlgmr.msra.gmra.mrb[14].mxu0 %vm37_vm0, %v1486_v35  ;;  %4296 = vmatmul.mubr.msk.f32.vlgmr.msra.gmra.mrb[14].mxu1 %vm37_vm0, %v1487_v15 }
 0x271   : > { %v4192_v12 = vpop.f32.mrb[0].mxu0  ;;  %v4199_v34 = vpop.f32.mrb[0].mxu1 }
 0x272   : > { %v2104_v16 = vpop.f32.mrb[1].mxu0  ;;  %v2185_v59 = vpop.f32.mrb[1].mxu1 }
 0x275   : > { %v4206_v0 = vpop.f32.mrb[2].mxu0  ;;  %v4213_v47 = vpop.f32.mrb[2].mxu1 }
 0x276   : > { %v3600_v29 = vcombine.low %v4192_v12, %v4206_v0  ;;  %v3601_v20 = vcombine.high %v4192_v12, %v4206_v0  ;;  %v3616_v60 = vcombine.low %v4199_v34, %v4213_v47  ;;  %v3617_v63 = vcombine.high %v4199_v34, %v4213_v47  ;;  %v2266_v46 = vpop.f32.mrb[3].mxu0  ;;  %v2347_v13 = vpop.f32.mrb[3].mxu1 }
 0x277   : > { %v3328_v55 = vcombine.low %v2104_v16, %v2266_v46  ;;  %v3329_v3 = vcombine.high %v2104_v16, %v2266_v46  ;;  %v3344_v26 = vcombine.low %v2185_v59, %v2347_v13  ;;  %v3345_v27 = vcombine.high %v2185_v59, %v2347_v13 }
 0x278   : > { %v3608_v22 = vrot.slane %v3600_v29, %v4617_v58  ;;  %v3615_v30 = vrot.slane %v3601_v20, %v4617_v58  ;;  %v3624_v25 = vrot.slane %v3616_v60, %v4617_v58  ;;  %v3631_v56 = vrot.slane %v3617_v63, %v4617_v58 }
 0x279   : > { %v3336_v50 = vrot.slane %v3328_v55, %v4617_v58  ;;  %v3343_v52 = vrot.slane %v3329_v3, %v4617_v58  ;;  %v3352_v62 = vrot.slane %v3344_v26, %v4617_v58  ;;  %v3359_v57 = vrot.slane %v3345_v27, %v4617_v58 }
 0x27a   : > { %v3664_v7 = vcombine.low %v3608_v22, %v3624_v25  ;;  %v3665_v39 = vcombine.high %v3608_v22, %v3624_v25  ;;  %v3680_v17 = vcombine.low %v3615_v30, %v3631_v56  ;;  %v3681_v53 = vcombine.high %v3615_v30, %v3631_v56 }
 0x27b   : > { %v3392_v41 = vcombine.low %v3336_v50, %v3352_v62  ;;  %v3393_v6 = vcombine.high %v3336_v50, %v3352_v62  ;;  %v3408_v1 = vcombine.low %v3343_v52, %v3359_v57  ;;  %v3409_v54 = vcombine.high %v3343_v52, %v3359_v57 }
 0x27c   : > { %v5203_v49 = vrot.slane %v3664_v7, %v4623_v5  ;;  %v3679_v19 = vrot.slane %v3665_v39, %v4623_v5  ;;  %v3688_v31 = vrot.slane %v3680_v17, %v4623_v5  ;;  %v5208_v61 = vrot.slane %v3681_v53, %v4623_v5 }
 0x27d   : > { %v5211_v10 = vrot.slane %v3392_v41, %v4623_v5  ;;  %v5214_v18 = vrot.slane %v3393_v6, %v4623_v5  ;;  %v5217_v9 = vrot.slane %v3408_v1, %v4623_v5  ;;  %v5220_v32 = vrot.slane %v3409_v54, %v4623_v5 }
 0x280   : > { %v4220_v14 = vpop.f32.mrb[4].mxu0  ;;  %v4227_v8 = vpop.f32.mrb[4].mxu1 }
 0x281   : > { %v2428_v24 = vpop.f32.mrb[5].mxu0  ;;  %v2509_v48 = vpop.f32.mrb[5].mxu1 }
 0x289   : > { %v4234_v28 = vpop.f32.mrb[6].mxu0 }
 0x28a   : > { %v4241_v21 = vpop.f32.mrb[6].mxu1  ;;  %v3632_v33 = vcombine.low %v4220_v14, %v4234_v28  ;;  %v3633_v51 = vcombine.high %v4220_v14, %v4234_v28  ;;  %v2590_v36 = vpop.f32.mrb[7].mxu0 }
 0x28b   : > { %v3648_v23 = vcombine.low %v4227_v8, %v4241_v21  ;;  %v3649_v45 = vcombine.high %v4227_v8, %v4241_v21  ;;  %v2671_v37 = vpop.f32.mrb[7].mxu1  ;;  %v3360_v11 = vcombine.low %v2428_v24, %v2590_v36  ;;  %v3361_v2 = vcombine.high %v2428_v24, %v2590_v36 }
 0x28c   : > { %v3376_v44 = vcombine.low %v2509_v48, %v2671_v37  ;;  %v3377_v4 = vcombine.high %v2509_v48, %v2671_v37  ;;  %v3640_v35 = vrot.slane %v3632_v33, %v4617_v58  ;;  %v3647_v15 = vrot.slane %v3633_v51, %v4617_v58 }
 0x28d   : > { %v3656_v12 = vrot.slane %v3648_v23, %v4617_v58  ;;  %v3663_v34 = vrot.slane %v3649_v45, %v4617_v58  ;;  %v3368_v16 = vrot.slane %v3360_v11, %v4617_v58  ;;  %v3375_v59 = vrot.slane %v3361_v2, %v4617_v58 }
 0x28e   : > { %v3384_v0 = vrot.slane %v3376_v44, %v4617_v58  ;;  %v3391_v47 = vrot.slane %v3377_v4, %v4617_v58 }
 0x28f   : > { %v3696_v29 = vcombine.low %v3640_v35, %v3656_v12  ;;  %v3697_v20 = vcombine.high %v3640_v35, %v3656_v12  ;;  %v3712_v60 = vcombine.low %v3647_v15, %v3663_v34  ;;  %v3713_v63 = vcombine.high %v3647_v15, %v3663_v34 }
 0x290   : > { %v3424_v46 = vcombine.low %v3368_v16, %v3384_v0  ;;  %v3425_v13 = vcombine.high %v3368_v16, %v3384_v0  ;;  %v3440_v55 = vcombine.low %v3375_v59, %v3391_v47  ;;  %v3441_v3 = vcombine.high %v3375_v59, %v3391_v47 }
 0x291   : > { %v5231_v26 = vrot.slane %v3696_v29, %v4623_v5  ;;  %v3711_v27 = vrot.slane %v3697_v20, %v4623_v5  ;;  %v3720_v22 = vrot.slane %v3712_v60, %v4623_v5  ;;  %v5236_v30 = vrot.slane %v3713_v63, %v4623_v5 }
 0x292   : > { %v5239_v25 = vrot.slane %v3424_v46, %v4623_v5  ;;  %v3439_v56 = vrot.slane %v3425_v13, %v4623_v5  ;;  %v5243_v50 = vrot.slane %v3440_v55, %v4623_v5  ;;  %v5246_v52 = vrot.slane %v3441_v3, %v4623_v5 }
 0x293   : > { %v3729_v62 = vcombine.high %v5203_v49, %v5231_v26  ;;  %v3730_v57 = vcombine.low %v3679_v19, %v3711_v27  ;;  %v3731_v7 = vcombine.high %v3679_v19, %v3711_v27  ;;  %v3732_v39 = vcombine.low %v3688_v31, %v3720_v22 }
 0x294   : > { %v3733_v17 = vcombine.high %v3688_v31, %v3720_v22  ;;  %v3734_v53 = vcombine.low %v5208_v61, %v5236_v30  ;;  %v3457_v41 = vcombine.high %v5211_v10, %v5239_v25  ;;  %v3458_v6 = vcombine.low %v5214_v18, %v3439_v56 }
 0x295   : > { %3930 = vrot.lane.b32.xlu0 %v3729_v62, %s4406_s15  ;;  %v3459_v1 = vcombine.high %v5214_v18, %v3439_v56  ;;  %v3460_v54 = vcombine.low %v5217_v9, %v5243_v50  ;;  %v3461_v14 = vcombine.high %v5217_v9, %v5243_v50  ;;  %v3462_v8 = vcombine.low %v5220_v32, %v5246_v52 }
 0x296   : > { %v3463_v24 = vcombine.high %v5220_v32, %v5246_v52  ;;  %v3735_v48 = vcombine.high %v5208_v61, %v5236_v30  ;;  %v3728_v19 = vcombine.low %v5203_v49, %v5231_v26  ;;  %v3456_v31 = vcombine.low %v5211_v10, %v5239_v25 }
 0x299   : > { %3938 = vrot.lane.b32.xlu0 %v3730_v57, %s4405_s14 }
 0x29d   : > { %3946 = vrot.lane.b32.xlu0 %v3731_v7, %s4404_s13 }
 0x2a1   : > { %3954 = vrot.lane.b32.xlu0 %v3732_v39, %s4403_s12 }
 0x2a5   : > { %3962 = vrot.lane.b32.xlu0 %v3733_v17, %s4402_s11 }
 0x2a9   : > { %3970 = vrot.lane.b32.xlu0 %v3734_v53, %s4400_s9 }
 0x2aa   : > { %v4248_v28 = vpop.f32.mrb[8].mxu0  ;;  %v4255_v21 = vpop.f32.mrb[8].mxu1 }
 0x2ab   : > { %v2752_v18 = vpop.f32.mrb[9].mxu0  ;;  %v2833_v33 = vpop.f32.mrb[9].mxu1 }
 0x2ad   : > { %3874 = vrot.lane.b32.xlu0 %v3457_v41, %s4406_s15 }
 0x2ae   : > { %v4262_v51 = vpop.f32.mrb[10].mxu0  ;;  %v4269_v23 = vpop.f32.mrb[10].mxu1 }
 0x2af   : > { %v3736_v45 = vcombine.low %v4248_v28, %v4262_v51  ;;  %v3737_v36 = vcombine.high %v4248_v28, %v4262_v51  ;;  %v3752_v37 = vcombine.low %v4255_v21, %v4269_v23  ;;  %v3753_v11 = vcombine.high %v4255_v21, %v4269_v23  ;;  %v2914_v2 = vpop.f32.mrb[11].mxu0  ;;  %v2995_v44 = vpop.f32.mrb[11].mxu1 }
 0x2b0   : > { %v3464_v4 = vcombine.low %v2752_v18, %v2914_v2  ;;  %v3465_v35 = vcombine.high %v2752_v18, %v2914_v2  ;;  %v3480_v15 = vcombine.low %v2833_v33, %v2995_v44  ;;  %v3481_v12 = vcombine.high %v2833_v33, %v2995_v44 }
 0x2b1   : > { %3882 = vrot.lane.b32.xlu0 %v3458_v6, %s4405_s14  ;;  %v3744_v34 = vrot.slane %v3736_v45, %v4617_v58  ;;  %v3751_v16 = vrot.slane %v3737_v36, %v4617_v58  ;;  %v3760_v59 = vrot.slane %v3752_v37, %v4617_v58  ;;  %v3767_v0 = vrot.slane %v3753_v11, %v4617_v58 }
 0x2b2   : > { %v3472_v47 = vrot.slane %v3464_v4, %v4617_v58  ;;  %v3479_v29 = vrot.slane %v3465_v35, %v4617_v58  ;;  %v3488_v20 = vrot.slane %v3480_v15, %v4617_v58  ;;  %v3495_v60 = vrot.slane %v3481_v12, %v4617_v58 }
 0x2b3   : > { %v3800_v63 = vcombine.low %v3744_v34, %v3760_v59  ;;  %v3801_v46 = vcombine.high %v3744_v34, %v3760_v59  ;;  %v3816_v13 = vcombine.low %v3751_v16, %v3767_v0  ;;  %v3817_v55 = vcombine.high %v3751_v16, %v3767_v0  ;;  %v4276_v3 = vpop.f32.mrb[12].mxu0  ;;  %v4283_v27 = vpop.f32.mrb[12].mxu1 }
 0x2b4   : > { %v3528_v22 = vcombine.low %v3472_v47, %v3488_v20  ;;  %v3529_v56 = vcombine.high %v3472_v47, %v3488_v20  ;;  %v3544_v62 = vcombine.low %v3479_v29, %v3495_v60  ;;  %v3545_v57 = vcombine.high %v3479_v29, %v3495_v60  ;;  %v3076_v7 = vpop.f32.mrb[13].mxu0  ;;  %v3157_v39 = vpop.f32.mrb[13].mxu1 }
 0x2b5   : > { %3890 = vrot.lane.b32.xlu0 %v3459_v1, %s4404_s13  ;;  %v5289_v17 = vrot.slane %v3800_v63, %v4623_v5  ;;  %v5292_v53 = vrot.slane %v3801_v46, %v4623_v5  ;;  %v5295_v41 = vrot.slane %v3816_v13, %v4623_v5  ;;  %v5298_v6 = vrot.slane %v3817_v55, %v4623_v5 }
 0x2b6   : > { %v5301_v21 = vrot.slane %v3528_v22, %v4623_v5  ;;  %v5304_v18 = vrot.slane %v3529_v56, %v4623_v5  ;;  %v5310_v33 = vrot.slane %v3545_v57, %v4623_v5 }
 0x2b9   : > { %3898 = vrot.lane.b32.xlu0 %v3460_v54, %s4403_s12  ;;  %v4290_v1 = vpop.f32.mrb[14].mxu0  ;;  %v4297_v28 = vpop.f32.mrb[14].mxu1  ;;  %v5307_v54 = vrot.slane %v3544_v62, %v4623_v5 }
 0x2ba   : > { %v3768_v51 = vcombine.low %v4276_v3, %v4290_v1  ;;  %v3769_v23 = vcombine.high %v4276_v3, %v4290_v1  ;;  %v3784_v45 = vcombine.low %v4283_v27, %v4297_v28  ;;  %v3785_v36 = vcombine.high %v4283_v27, %v4297_v28  ;;  %v3238_v37 = vpop.f32.mrb[15].mxu0  ;;  %v3319_v11 = vpop.f32.mrb[15].mxu1 }
 0x2bb   : > { %v3496_v2 = vcombine.low %v3076_v7, %v3238_v37  ;;  %v3497_v44 = vcombine.high %v3076_v7, %v3238_v37  ;;  %v3512_v4 = vcombine.low %v3157_v39, %v3319_v11  ;;  %v3513_v35 = vcombine.high %v3157_v39, %v3319_v11 }
 0x2bc   : > { %v3776_v15 = vrot.slane %v3768_v51, %v4617_v58  ;;  %v3783_v12 = vrot.slane %v3769_v23, %v4617_v58  ;;  %v3792_v34 = vrot.slane %v3784_v45, %v4617_v58  ;;  %v3799_v16 = vrot.slane %v3785_v36, %v4617_v58 }
 0x2bd   : > { %3906 = vrot.lane.b32.xlu0 %v3461_v14, %s4402_s11  ;;  %v3504_v59 = vrot.slane %v3496_v2, %v4617_v58  ;;  %v3511_v0 = vrot.slane %v3497_v44, %v4617_v58  ;;  %v3520_v47 = vrot.slane %v3512_v4, %v4617_v58  ;;  %v3527_v29 = vrot.slane %v3513_v35, %v4617_v58 }
 0x2be   : > { %v3832_v20 = vcombine.low %v3776_v15, %v3792_v34  ;;  %v3833_v60 = vcombine.high %v3776_v15, %v3792_v34  ;;  %v3848_v9 = vcombine.low %v3783_v12, %v3799_v16  ;;  %v3849_v50 = vcombine.high %v3783_v12, %v3799_v16 }
 0x2bf   : > { %v3560_v14 = vcombine.low %v3504_v59, %v3520_v47  ;;  %v3561_v63 = vcombine.high %v3504_v59, %v3520_v47  ;;  %v3576_v46 = vcombine.low %v3511_v0, %v3527_v29  ;;  %v3577_v13 = vcombine.high %v3511_v0, %v3527_v29 }
 0x2c0   : > { %v5329_v55 = vrot.slane %v3832_v20, %v4623_v5  ;;  %v3847_v3 = vrot.slane %v3833_v60, %v4623_v5  ;;  %v3856_v58 = vrot.slane %v3848_v9, %v4623_v5  ;;  %v3863_v27 = vrot.slane %v3849_v50, %v4623_v5 }
 0x2c1   : > { %3914 = vrot.lane.b32.xlu0 %v3462_v8, %s4400_s9  ;;  %v5335_v22 = vrot.slane %v3560_v14, %v4623_v5  ;;  %v3575_v56 = vrot.slane %v3561_v63, %v4623_v5  ;;  %v3584_v62 = vrot.slane %v3576_v46, %v4623_v5  ;;  %v3591_v57 = vrot.slane %v3577_v13, %v4623_v5 }
 0x2c2   : > { %v3865_v8 = vcombine.high %v5289_v17, %v5329_v55  ;;  %v3866_v7 = vcombine.low %v5292_v53, %v3847_v3  ;;  %v3867_v39 = vcombine.high %v5292_v53, %v3847_v3  ;;  %v3868_v1 = vcombine.low %v5295_v41, %v3856_v58 }
 0x2c3   : > { %v3869_v28 = vcombine.high %v5295_v41, %v3856_v58  ;;  %v3870_v51 = vcombine.low %v5298_v6, %v3863_v27  ;;  %v3593_v23 = vcombine.high %v5301_v21, %v5335_v22  ;;  %v3594_v45 = vcombine.low %v5304_v18, %v3575_v56 }
 0x2c4   : > { %3932 = vrot.lane.b32.xlu1 %v3865_v8, %s4406_s15  ;;  %v3595_v5 = vcombine.high %v5304_v18, %v3575_v56  ;;  %v3596_v53 = vcombine.low %v5307_v54, %v3584_v62  ;;  %v3597_v41 = vcombine.high %v5307_v54, %v3584_v62  ;;  %v3598_v36 = vcombine.low %v5310_v33, %v3591_v57 }
 0x2c5   : > { %3922 = vrot.lane.b32.xlu0 %v3463_v24, %s4401_s10  ;;  %v3599_v37 = vcombine.high %v5310_v33, %v3591_v57  ;;  %v3871_v11 = vcombine.high %v5298_v6, %v3863_v27  ;;  %v3864_v2 = vcombine.low %v5289_v17, %v5329_v55  ;;  %v3592_v32 = vcombine.low %v5301_v21, %v5335_v22 }
 0x2c8   : > { %3940 = vrot.lane.b32.xlu1 %v3866_v7, %s4405_s14 }
 0x2c9   : > { %3978 = vrot.lane.b32.xlu0 %v3735_v48, %s4401_s10 }
 0x2cc   : > { %3948 = vrot.lane.b32.xlu1 %v3867_v39, %s4404_s13 }
 0x2d0   : > { %3956 = vrot.lane.b32.xlu1 %v3868_v1, %s4403_s12 }
 0x2d4   : > { %3964 = vrot.lane.b32.xlu1 %v3869_v28, %s4402_s11 }
 0x2d8   : > { %3972 = vrot.lane.b32.xlu1 %v3870_v51, %s4400_s9 }
 0x2dc   : > { %3876 = vrot.lane.b32.xlu1 %v3593_v23, %s4406_s15 }
 0x2e0   : > { %3884 = vrot.lane.b32.xlu1 %v3594_v45, %s4405_s14 }
 0x2e4   : > { %3892 = vrot.lane.b32.xlu1 %v3595_v5, %s4404_s13 }
 0x2e8   : > { %3900 = vrot.lane.b32.xlu1 %v3596_v53, %s4403_s12 }
 0x2ec   : > { %3908 = vrot.lane.b32.xlu1 %v3597_v41, %s4402_s11 }
 0x2f0   : > { %3916 = vrot.lane.b32.xlu1 %v3598_v36, %s4400_s9 }
 0x2f4   : > { %3924 = vrot.lane.b32.xlu1 %v3599_v37, %s4401_s10 }
 0x2f8   : > { %3980 = vrot.lane.b32.xlu1 %v3871_v11, %s4401_s10 }
 0x307   : > { %v3931_v61 = vpop.permute.xlu0 %3930 }
 0x308   : > { %v4004_v59 = vsel %vm37_vm0, %v3728_v19, %v3931_v61 }
 0x30b   : > { %v3939_v30 = vpop.permute.xlu0 %3938 }
 0x30c   : > { %v4006_v25 = vsel %vm3986_vm1, %v4004_v59, %v3939_v30 }
 0x30f   : > { %v3947_v52 = vpop.permute.xlu0 %3946 }
 0x310   : > { %v4008_v29 = vsel %vm3989_vm2, %v4006_v25, %v3947_v52 }
 0x313   : > { %v3955_v24 = vpop.permute.xlu0 %3954 }
 0x314   : > { %v4010_v60 = vsel %vm3992_vm3, %v4008_v29, %v3955_v24 }
 0x317   : > { %v3963_v48 = vpop.permute.xlu0 %3962 }
 0x318   : > { %v4012_v49 = vsel %vm3995_vm4, %v4010_v60, %v3963_v48 }
 0x31b   : > { %v3971_v6 = vpop.permute.xlu0 %3970 }
 0x31c   : > { %v4014_v26 = vsel %vm3998_vm6, %v4012_v49, %v3971_v6 }
 0x31f   : > { %v3875_v18 = vpop.permute.xlu0 %3874 }
 0x320   : > { %v3984_v35 = vsel %vm37_vm0, %v3456_v31, %v3875_v18 }
 0x323   : > { %v3883_v54 = vpop.permute.xlu0 %3882 }
 0x324   : > { %v3987_v15 = vsel %vm3986_vm1, %v3984_v35, %v3883_v54 }
 0x327   : > { %v3891_v33 = vpop.permute.xlu0 %3890 }
 0x328   : > { %v3990_v34 = vsel %vm3989_vm2, %v3987_v15, %v3891_v33 }
 0x32b   : > { %v3899_v44 = vpop.permute.xlu0 %3898 }
 0x32c   : > { %v3993_v16 = vsel %vm3992_vm3, %v3990_v34, %v3899_v44 }
 0x32f   : > { %v3907_v4 = vpop.permute.xlu0 %3906 }
 0x330   : > { %v3996_v10 = vsel %vm3995_vm4, %v3993_v16, %v3907_v4 }
 0x333   : > { %v3915_v12 = vpop.permute.xlu0 %3914 }
 0x334   : > { %v3999_v31 = vsel %vm3998_vm6, %v3996_v10, %v3915_v12 }
 0x336   : > { %v3933_v47 = vpop.permute.xlu1 %3932 }
 0x337   : > { %v3923_v0 = vpop.permute.xlu0 %3922  ;;  %v4005_v23 = vsel %vm37_vm0, %v3864_v2, %v3933_v47 }
 0x338   : > { %v4002_v20 = vsel %vm4001_vm5, %v3999_v31, %v3923_v0 }
 0x339   : > { %v4018_v9 = vadd.f32 %v4002_v20, %v4514_v38 }
 0x33a   : > { %v3941_v14 = vpop.permute.xlu1 %3940 }
 0x33b   : > { %v4022_v19 = vmax.f32 %v4018_v9, 0.0  ;;  %v3979_v50 = vpop.permute.xlu0 %3978  ;;  %v4007_v21 = vsel %vm3986_vm1, %v4005_v23, %v3941_v14 }
 0x33c   : > { %v4016_v63 = vsel %vm4001_vm5, %v4014_v26, %v3979_v50 }
 0x33d   : > { %4028 = vst [vmem:[%s5406_s18] sm:$0xff] %v4022_v19  ;;  %v4019_v38 = vadd.f32 %v4016_v63, %v4532_v40 }
 0x33e   : > { %v3949_v13 = vpop.permute.xlu1 %3948 }
 0x33f   : > { %v4023_v46 = vmax.f32 %v4019_v38, 0.0  ;;  %v4009_v53 = vsel %vm3989_vm2, %v4007_v21, %v3949_v13 }
 0x341   : > { %4029 = vst [vmem:[%s5406_s18 + $0x8] sm:$0xff] %v4023_v46 }
 0x342   : > { %v3957_v3 = vpop.permute.xlu1 %3956 }
 0x343   : > { %v4011_v36 = vsel %vm3992_vm3, %v4009_v53, %v3957_v3 }
 0x346   : > { %v3965_v58 = vpop.permute.xlu1 %3964 }
 0x347   : > { %v4013_v17 = vsel %vm3995_vm4, %v4011_v36, %v3965_v58 }
 0x34a   : > { %v3973_v27 = vpop.permute.xlu1 %3972 }
 0x34b   : > { %v4015_v55 = vsel %vm3998_vm6, %v4013_v17, %v3973_v27 }
 0x34e   : > { %v3877_v56 = vpop.permute.xlu1 %3876 }
 0x34f   : > { %v3985_v39 = vsel %vm37_vm0, %v3592_v32, %v3877_v56 }
 0x352   : > { %v3885_v62 = vpop.permute.xlu1 %3884 }
 0x353   : > { %v3988_v1 = vsel %vm3986_vm1, %v3985_v39, %v3885_v62 }
 0x356   : > { %v3893_v57 = vpop.permute.xlu1 %3892 }
 0x357   : > { %v3991_v40 = vsel %vm3989_vm2, %v3988_v1, %v3893_v57 }
 0x35a   : > { %v3901_v8 = vpop.permute.xlu1 %3900 }
 0x35b   : > { %v3994_v51 = vsel %vm3992_vm3, %v3991_v40, %v3901_v8 }
 0x35e   : > { %v3909_v7 = vpop.permute.xlu1 %3908 }
 0x35f   : > { %v3997_v45 = vsel %vm3995_vm4, %v3994_v51, %v3909_v7 }
 0x362   : > { %v3917_v28 = vpop.permute.xlu1 %3916 }
 0x363   : > { %v4000_v22 = vsel %vm3998_vm6, %v3997_v45, %v3917_v28 }
 0x366   : > { %v3925_v5 = vpop.permute.xlu1 %3924 }
 0x367   : > { %v4003_v41 = vsel %vm4001_vm5, %v4000_v22, %v3925_v5 }
 0x368   : > { %v4020_v37 = vadd.f32 %v4003_v41, %v4582_v42 }
 0x36a   : > { %v4024_v11 = vmax.f32 %v4020_v37, 0.0  ;;  %v3981_v2 = vpop.permute.xlu1 %3980  ;;  %211 = sbr.rel (!%p209_p0) target bundleno = 229 (0xe5), region = 43 }
 0x36b   : > { %v4017_v32 = vsel %vm4001_vm5, %v4015_v55, %v3981_v2 }
 0x36c   : > { %4030 = vst [vmem:[%s5406_s18 + $0x10] sm:$0xff] %v4024_v11  ;;  %v4021_v61 = vadd.f32 %v4017_v32, %v4597_v43 }
 0x36e   : > { %v4025_v30 = vmax.f32 %v4021_v61, 0.0 }
 0x370   : > { %4031 = vst [vmem:[%s5406_s18 + $0x18] sm:$0xff] %v4025_v30 }

</bundles_post_ra>
